<compile_context>
chip_gen: v7x
topology: tpu7x:2x2x1
jax: 0.10.0
libtpu: 0.0.40
codegen_flags: <defaults>
</compile_context>

<pallas_src>
import functools

import jax
import jax.numpy as jnp
import numpy as np
from jax.experimental import pallas as pl
from jax.experimental.pallas import tpu as pltpu


def _elu(v):
    # expm1-accurate ELU without relying on an expm1 lowering rule: a short
    # Taylor series near zero avoids exp(v) - 1.0 cancellation.
    taylor = v * (1.0 + v * (0.5 + v * (1.0 / 6.0)))
    em1 = jnp.where(jnp.abs(v) < 1e-2, taylor, jnp.exp(v) - 1.0)
    return jnp.where(v > 0.0, v, em1)


def _het_gcn_kernel(x_a_ref, x_b_ref, adj_ref, u_a_ref, u_c_ref, out_ref, *,
                    approx_recip):
    bt, n, d = x_a_ref.shape

    x_a = x_a_ref[...]                       # [Bt, N, D]  (compute dtype)
    x_b = x_b_ref[...]                       # [Bt, M, D]
    adj = adj_ref[...]                       # [Bt, N, M]

    # Row sums of the adjacency, kept as a [Bt, N, 1] column.  The division is
    # deferred (the diagonal scaling commutes with everything downstream), so
    # there is no [Bt,N,D] normalization multiply and no adj_norm temporary.
    # (The f32 copy of adj here is small: M << D for the streamed tensors.)
    row_sums = jnp.sum(adj.astype(jnp.float32), axis=2, keepdims=True)
    row_sums = jnp.where(row_sums == 0.0, 1.0, row_sums)   # torch: zero rows -> 1
    inv_rows = 1.0 / row_sums                               # exact (feeds scores)

    # Neighbor aggregation on the RAW adjacency (batched MXU matmul, f32 acc).
    compat_raw = jnp.einsum("bnm,bmd->bnd", adj, x_b,
                            preferred_element_type=jnp.float32)   # [Bt,N,D] f32

    r = bt * n
    x_a2 = x_a.reshape(r, d)                 # [R, D]  compute dtype
    compat2 = compat_raw.reshape(r, d)       # [R, D]  f32 (never rounded down)
    inv2 = inv_rows.reshape(r, 1)            # [R, 1]  f32

    # W_v folded into the Q/K projections (exact: ELU comes after W_v).
    #   u_a lanes: 0 -> u_q + u_k  (self score),  1 -> u_q (query part, reused)
    #   u_c lanes: 0 -> u_k        (neighbor-key score, pre row-normalization)
    pa = jnp.dot(x_a2, u_a_ref[...], preferred_element_type=jnp.float32)    # [R,128]
    pc = jnp.dot(compat2, u_c_ref[...], preferred_element_type=jnp.float32)  # [R,128]

    s_self = _elu(pa[:, 0:1])                            # elu(K_self.wv_k + Q.wv_q)
    s_neigh = _elu(pa[:, 1:2] + pc[:, 0:1] * inv2)       # elu(K_neigh.wv_k + Q.wv_q)

    # 2-way softmax (self vs. neighbor) and weighted combine; the row
    # normalization is folded into the neighbor combine weight.
    m = jnp.maximum(s_self, s_neigh)
    e_s = jnp.exp(s_self - m)
    e_n = jnp.exp(s_neigh - m)
    inv_den = pl.reciprocal(e_s + e_n, approx=approx_recip)
    w_self = e_s * inv_den
    w_neigh = (e_n * inv_den) * inv2

    out = w_self * x_a2.astype(jnp.float32) + w_neigh * compat2
    out_ref[...] = out.reshape(bt, n, d).astype(out_ref.dtype)


def het_gcn_layer(x_a, x_b, adj, wq, wk, wv, *, block_b=None,
                  compute_dtype=None, output_dtype=None,
                  approx_reciprocal=True):
    """HetGCNLayer.forward.

    x_a: [B, N, D], x_b: [B, M, D], adj: [B, N, M].
    wq, wk: nn.Linear weights [D, D] (bias=False); wv: [1, 2*D].
    compute_dtype: dtype for the streamed activations / MXU matmuls
      (jnp.bfloat16 recommended in production; None keeps the input dtype).
    output_dtype: dtype of the result (None -> follows compute_dtype).
    The score/softmax/combine epilogue is always f32.
    """
    B, N, D = x_a.shape
    _, M, _ = x_b.shape
    cdt = jnp.dtype(compute_dtype) if compute_dtype is not None else jnp.dtype(x_a.dtype)
    odt = jnp.dtype(output_dtype) if output_dtype is not None else cdt

    x_a_c = x_a.astype(cdt)
    x_b_c = x_b.astype(cdt)
    adj_c = adj.astype(cdt)

    # ---- fold W_v into W_q / W_k (exact; ELU is applied after W_v) --------
    # PyTorch: W_v(cat((K, Q), -1)) = K @ wv[:, :D]^T + Q @ wv[:, D:]^T, hence
    #   u_q = Wq^T @ wv_q,  u_k = Wk^T @ wv_k   ([D] vectors).
    wv_k = wv[0, :D].astype(jnp.float32)
    wv_q = wv[0, D:].astype(jnp.float32)
    u_q = wq.astype(jnp.float32).T @ wv_q
    u_k = wk.astype(jnp.float32).T @ wv_k

    u_a = jnp.zeros((D, 128), jnp.float32)
    u_a = u_a.at[:, 0].set(u_q + u_k)         # -> self score
    u_a = u_a.at[:, 1].set(u_q)               # -> query half of neighbor score
    u_a = u_a.astype(cdt)                     # multiplies the compute-dtype x_a
    u_c = jnp.zeros((D, 128), jnp.float32)
    u_c = u_c.at[:, 0].set(u_k)               # multiplies the f32 compat (stays f32)

    # ---- generation-aware VMEM budgeting / block sizing --------------------
    try:
        info = pltpu.get_tpu_info()
        vmem_cap = int(getattr(info, "vmem_capacity_bytes", 0)) or 128 * 1024 * 1024
    except Exception:
        vmem_cap = 64 * 1024 * 1024           # assume the smallest (v7x per-TC)
    vmem_limit = min(vmem_cap // 2, 64 * 1024 * 1024)   # 64 MiB v5e/v6e, 32 MiB v7x
    budget = (vmem_limit * 2) // 3                       # working-set target w/ headroom

    sz_c, sz_o = cdt.itemsize, odt.itemsize
    w_bytes = 2 * 2 * D * 128 * 4             # (double-buffered) weight tiles

    def footprint(bb):
        r = bb * N
        io = (2 * bb * (N * D * sz_c + M * D * sz_c + N * M * sz_c)   # inputs, 2-buf
              + 2 * bb * N * D * sz_o)                                # output, 2-buf
        interm = (3 * r * D + 2 * r * 128 + bb * N * M) * 4           # f32 temporaries
        return io + interm + w_bytes

    if block_b is None:
        divs = [d for d in range(1, B + 1) if B % d == 0]
        if B >= 2:
            # Keep >= 2 grid steps so the "parallel" batch axis can shard across
            # v7x's two TensorCores; costs at most one ~0.35 us step on 1-TC chips.
            divs = [d for d in divs if d < B]
        fitting = [d for d in divs if footprint(d) <= budget]
        aligned = [d for d in fitting if (d * N) % 8 == 0]   # sublane-aligned reshapes
        block_b = max(aligned or fitting or [1])
    assert B % block_b == 0, "block_b must divide the batch dimension"

    kernel = functools.partial(_het_gcn_kernel, approx_recip=approx_reciprocal)

    return pl.pallas_call(
        kernel,
        out_shape=jax.ShapeDtypeStruct((B, N, D), odt),
        grid_spec=pltpu.PrefetchScalarGridSpec(
            num_scalar_prefetch=0,
            grid=(B // block_b,),
            in_specs=[
                pl.BlockSpec((block_b, N, D), lambda b: (b, 0, 0)),   # x_a
                pl.BlockSpec((block_b, M, D), lambda b: (b, 0, 0)),   # x_b
                pl.BlockSpec((block_b, N, M), lambda b: (b, 0, 0)),   # adj
                pl.BlockSpec((D, 128), lambda b: (0, 0)),             # u_a (self/q)
                pl.BlockSpec((D, 128), lambda b: (0, 0)),             # u_c (neigh k)
            ],
            out_specs=pl.BlockSpec((block_b, N, D), lambda b: (b, 0, 0)),
        ),
        compiler_params=pltpu.CompilerParams(
            dimension_semantics=("parallel",),
            vmem_limit_bytes=vmem_limit,
        ),
    )(x_a_c, x_b_c, adj_c, u_a, u_c)


def het_gcn_reference(x_a, x_b, adj, wq, wk, wv):
    """Pure-JAX reference mirroring the PyTorch forward exactly."""
    row_sums = jnp.sum(adj, axis=2)
    row_sums = jnp.where(row_sums == 0.0, 1.0, row_sums)
    adj_norm = adj / row_sums[..., None]
    compat = adj_norm @ x_b
    Q = x_a @ wq.T
    K_self = x_a @ wk.T
    K_neigh = compat @ wk.T
    cs = jax.nn.elu(jnp.concatenate([K_self, Q], -1) @ wv.T)
    cn = jax.nn.elu(jnp.concatenate([K_neigh, Q], -1) @ wv.T)
    w = jax.nn.softmax(jnp.concatenate([cs, cn], -1), -1)
    return w[..., 0:1] * x_a + w[..., 1:2] * compat


def _make_inputs(key, B, N, M, D):
    k1, k2, k3, k4, k5, k6 = jax.random.split(key, 6)

    # Round values through bf16 so they are exactly representable regardless of
    # the MXU default f32-matmul precision on either side of the comparison.
    def bf16_exact(x):
        return x.astype(jnp.bfloat16).astype(jnp.float32)

    x_a = bf16_exact(jax.random.normal(k1, (B, N, D), jnp.float32))
    x_b = bf16_exact(jax.random.normal(k2, (B, M, D), jnp.float32))
    adj = jax.random.bernoulli(k3, 0.5, (B, N, M)).astype(jnp.float32)
    adj = adj.at[0, min(3, N - 1), :].set(0.0)   # exercise the zero-row path
    wq = bf16_exact(jax.random.normal(k4, (D, D), jnp.float32) * 0.1)
    wk = bf16_exact(jax.random.normal(k5, (D, D), jnp.float32) * 0.1)
    wv = bf16_exact(jax.random.normal(k6, (1, 2 * D), jnp.float32) * 0.1)
    return x_a, x_b, adj, wq, wk, wv


def _run_case(label, *, B, N, M, D, block_b, compute_dtype, approx, tol, key):
    x_a, x_b, adj, wq, wk, wv = _make_inputs(key, B, N, M, D)
    out = het_gcn_layer(x_a, x_b, adj, wq, wk, wv, block_b=block_b,
                        compute_dtype=compute_dtype,
                        approx_reciprocal=approx)
    out = jax.block_until_ready(out)
    ref = het_gcn_reference(x_a, x_b, adj, wq, wk, wv)
    np.testing.assert_allclose(np.asarray(out.astype(jnp.float32)),
                               np.asarray(ref.astype(jnp.float32)),
                               rtol=tol, atol=tol,
                               err_msg=f"case {label} mismatch")


if __name__ == "__main__":
    root = jax.random.PRNGKey(0)

    # Case 1: D = 128, f32 compute, exact reciprocals, auto block sizing
    # (picks block_b=4 -> 2 grid steps).  Tolerance leaves headroom for
    # default-precision (bf16-operand) MXU matmuls on either side.
    _run_case("f32_D128", B=8, N=16, M=16, D=128, block_b=None,
              compute_dtype=None, approx=False, tol=3e-2,
              key=jax.random.fold_in(root, 0))

    # Case 2: production path -- bf16 matmuls + bf16 writeback, approximate
    # EUP reciprocal for the softmax denominator, unpadded D=32 lane dim.
    _run_case("bf16_D32", B=4, N=8, M=8, D=32, block_b=2,
              compute_dtype=jnp.bfloat16, approx=True, tol=5e-2,
              key=jax.random.fold_in(root, 1))

    print("KERNEL_OK")
</pallas_src>

<mosaic_0001>
module attributes {stable_mosaic.version = 11 : i64} {
  func.func @_het_gcn_kernel(%arg0: i32, %arg1: memref<4x16x128xf32, #tpu.memory_space<vmem>>, %arg2: memref<4x16x128xf32, #tpu.memory_space<vmem>>, %arg3: memref<4x16x16xf32, #tpu.memory_space<vmem>>, %arg4: memref<128x128xf32, #tpu.memory_space<vmem>>, %arg5: memref<128x128xf32, #tpu.memory_space<vmem>>, %arg6: memref<4x16x128xf32, #tpu.memory_space<vmem>>) attributes {dimension_semantics = [#tpu.dimension_semantics<parallel>], iteration_bounds = array<i64: 2>, scalar_prefetch = 0 : i64, scratch_operands = 0 : i64, tpu.core_type = #tpu.core_type<tc>, window_params = [{transform_indices = @transform_0, window_bounds = array<i64: 4, 16, 128>}, {transform_indices = @transform_1, window_bounds = array<i64: 4, 16, 128>}, {transform_indices = @transform_2, window_bounds = array<i64: 4, 16, 16>}, {pipeline_mode = #tpu.pipeline_mode<synchronous>, transform_indices = @transform_3, window_bounds = array<i64: 128, 128>}, {pipeline_mode = #tpu.pipeline_mode<synchronous>, transform_indices = @transform_4, window_bounds = array<i64: 128, 128>}, {transform_indices = @transform_5, window_bounds = array<i64: 4, 16, 128>}]} {
    %c0 = arith.constant 0 : index
    %c0_0 = arith.constant 0 : index
    %c0_1 = arith.constant 0 : index
    %0 = vector.load %arg1[%c0, %c0_0, %c0_1] : memref<4x16x128xf32, #tpu.memory_space<vmem>>, vector<4x16x128xf32>
    %c0_2 = arith.constant 0 : index
    %c0_3 = arith.constant 0 : index
    %c0_4 = arith.constant 0 : index
    %1 = vector.load %arg2[%c0_2, %c0_3, %c0_4] : memref<4x16x128xf32, #tpu.memory_space<vmem>>, vector<4x16x128xf32>
    %c0_5 = arith.constant 0 : index
    %c0_6 = arith.constant 0 : index
    %c0_7 = arith.constant 0 : index
    %2 = vector.load %arg3[%c0_5, %c0_6, %c0_7] : memref<4x16x16xf32, #tpu.memory_space<vmem>>, vector<4x16x16xf32>
    %cst = arith.constant dense<0.000000e+00> : vector<4x16xf32>
    %3 = vector.multi_reduction <add>, %2, %cst [2] : vector<4x16x16xf32> to vector<4x16xf32>
    %4 = vector.shape_cast %3 : vector<4x16xf32> to vector<4x16x1xf32>
    %cst_8 = arith.constant 0.000000e+00 : f32
    %5 = vector.broadcast %cst_8 : f32 to vector<4x16x1xf32>
    %6 = arith.cmpf oeq, %4, %5 : vector<4x16x1xf32>
    %cst_9 = arith.constant 1.000000e+00 : f32
    %7 = vector.broadcast %cst_9 : f32 to vector<4x16x1xf32>
    %8 = arith.select %6, %7, %4 : vector<4x16x1xi1>, vector<4x16x1xf32>
    %cst_10 = arith.constant 1.000000e+00 : f32
    %9 = vector.broadcast %cst_10 : f32 to vector<4x16x1xf32>
    %10 = arith.divf %9, %8 : vector<4x16x1xf32>
    "tpu.trace_start"() <{level = 10 : i32, message = "bnm,bmd->bnd"}> : () -> ()
    %cst_11 = arith.constant dense<0.000000e+00> : vector<4x16x128xf32>
    %11 = tpu.matmul %2, %1, %cst_11 {dimension_numbers = #tpu.dot_dimension_numbers<[2], [1], [1], [2], [0, 0, 0, 1, 1, 2], [0], [0]>} : vector<4x16x16xf32>, vector<4x16x128xf32>, vector<4x16x128xf32> -> vector<4x16x128xf32>
    "tpu.trace_stop"() : () -> ()
    %12 = vector.shape_cast %0 : vector<4x16x128xf32> to vector<64x128xf32>
    %13 = vector.shape_cast %11 : vector<4x16x128xf32> to vector<64x128xf32>
    %14 = vector.shape_cast %10 : vector<4x16x1xf32> to vector<64x1xf32>
    %c0_12 = arith.constant 0 : index
    %c0_13 = arith.constant 0 : index
    %15 = vector.load %arg4[%c0_12, %c0_13] : memref<128x128xf32, #tpu.memory_space<vmem>>, vector<128x128xf32>
    %cst_14 = arith.constant dense<0.000000e+00> : vector<64x128xf32>
    %16 = tpu.matmul %12, %15, %cst_14 {dimension_numbers = #tpu.dot_dimension_numbers<[1], [0], [0], [1], [0, 0, 1, 1], [], []>} : vector<64x128xf32>, vector<128x128xf32>, vector<64x128xf32> -> vector<64x128xf32>
    %c0_15 = arith.constant 0 : index
    %c0_16 = arith.constant 0 : index
    %17 = vector.load %arg5[%c0_15, %c0_16] : memref<128x128xf32, #tpu.memory_space<vmem>>, vector<128x128xf32>
    %cst_17 = arith.constant dense<0.000000e+00> : vector<64x128xf32>
    %18 = tpu.matmul %13, %17, %cst_17 {dimension_numbers = #tpu.dot_dimension_numbers<[1], [0], [0], [1], [0, 0, 1, 1], [], []>} : vector<64x128xf32>, vector<128x128xf32>, vector<64x128xf32> -> vector<64x128xf32>
    %19 = vector.extract_strided_slice %16 {offsets = [0, 0], sizes = [64, 1], strides = [1, 1]} : vector<64x128xf32> to vector<64x1xf32>
    %cst_18 = arith.constant 0.166666672 : f32
    %20 = vector.broadcast %cst_18 : f32 to vector<64x1xf32>
    %21 = arith.mulf %19, %20 : vector<64x1xf32>
    %cst_19 = arith.constant 5.000000e-01 : f32
    %22 = vector.broadcast %cst_19 : f32 to vector<64x1xf32>
    %23 = arith.addf %22, %21 : vector<64x1xf32>
    %24 = arith.mulf %19, %23 : vector<64x1xf32>
    %cst_20 = arith.constant 1.000000e+00 : f32
    %25 = vector.broadcast %cst_20 : f32 to vector<64x1xf32>
    %26 = arith.addf %25, %24 : vector<64x1xf32>
    %27 = arith.mulf %19, %26 : vector<64x1xf32>
    %28 = math.absf %19 : vector<64x1xf32>
    %cst_21 = arith.constant 0.00999999977 : f32
    %29 = vector.broadcast %cst_21 : f32 to vector<64x1xf32>
    %30 = arith.cmpf olt, %28, %29 : vector<64x1xf32>
    %31 = math.exp %19 : vector<64x1xf32>
    %cst_22 = arith.constant 1.000000e+00 : f32
    %32 = vector.broadcast %cst_22 : f32 to vector<64x1xf32>
    %33 = arith.subf %31, %32 : vector<64x1xf32>
    %34 = arith.select %30, %27, %33 : vector<64x1xi1>, vector<64x1xf32>
    %cst_23 = arith.constant 0.000000e+00 : f32
    %35 = vector.broadcast %cst_23 : f32 to vector<64x1xf32>
    %36 = arith.cmpf ogt, %19, %35 : vector<64x1xf32>
    %37 = arith.select %36, %19, %34 : vector<64x1xi1>, vector<64x1xf32>
    %38 = vector.extract_strided_slice %16 {offsets = [0, 1], sizes = [64, 1], strides = [1, 1]} : vector<64x128xf32> to vector<64x1xf32>
    %39 = vector.extract_strided_slice %18 {offsets = [0, 0], sizes = [64, 1], strides = [1, 1]} : vector<64x128xf32> to vector<64x1xf32>
    %40 = arith.mulf %39, %14 : vector<64x1xf32>
    %41 = arith.addf %38, %40 : vector<64x1xf32>
    %cst_24 = arith.constant 0.166666672 : f32
    %42 = vector.broadcast %cst_24 : f32 to vector<64x1xf32>
    %43 = arith.mulf %41, %42 : vector<64x1xf32>
    %cst_25 = arith.constant 5.000000e-01 : f32
    %44 = vector.broadcast %cst_25 : f32 to vector<64x1xf32>
    %45 = arith.addf %44, %43 : vector<64x1xf32>
    %46 = arith.mulf %41, %45 : vector<64x1xf32>
    %cst_26 = arith.constant 1.000000e+00 : f32
    %47 = vector.broadcast %cst_26 : f32 to vector<64x1xf32>
    %48 = arith.addf %47, %46 : vector<64x1xf32>
    %49 = arith.mulf %41, %48 : vector<64x1xf32>
    %50 = math.absf %41 : vector<64x1xf32>
    %cst_27 = arith.constant 0.00999999977 : f32
    %51 = vector.broadcast %cst_27 : f32 to vector<64x1xf32>
    %52 = arith.cmpf olt, %50, %51 : vector<64x1xf32>
    %53 = math.exp %41 : vector<64x1xf32>
    %cst_28 = arith.constant 1.000000e+00 : f32
    %54 = vector.broadcast %cst_28 : f32 to vector<64x1xf32>
    %55 = arith.subf %53, %54 : vector<64x1xf32>
    %56 = arith.select %52, %49, %55 : vector<64x1xi1>, vector<64x1xf32>
    %cst_29 = arith.constant 0.000000e+00 : f32
    %57 = vector.broadcast %cst_29 : f32 to vector<64x1xf32>
    %58 = arith.cmpf ogt, %41, %57 : vector<64x1xf32>
    %59 = arith.select %58, %41, %56 : vector<64x1xi1>, vector<64x1xf32>
    %60 = arith.maximumf %37, %59 : vector<64x1xf32>
    %61 = arith.subf %37, %60 : vector<64x1xf32>
    %62 = math.exp %61 : vector<64x1xf32>
    %63 = arith.subf %59, %60 : vector<64x1xf32>
    %64 = math.exp %63 : vector<64x1xf32>
    %65 = arith.addf %62, %64 : vector<64x1xf32>
    %66 = tpu.reciprocal %65 : vector<64x1xf32> -> vector<64x1xf32>
    %67 = arith.mulf %62, %66 : vector<64x1xf32>
    %68 = arith.mulf %64, %66 : vector<64x1xf32>
    %69 = arith.mulf %68, %14 : vector<64x1xf32>
    %70 = vector.broadcast %67 : vector<64x1xf32> to vector<64x128xf32>
    %71 = arith.mulf %70, %12 : vector<64x128xf32>
    %72 = vector.broadcast %69 : vector<64x1xf32> to vector<64x128xf32>
    %73 = arith.mulf %72, %13 : vector<64x128xf32>
    %74 = arith.addf %71, %73 : vector<64x128xf32>
    %75 = vector.shape_cast %74 : vector<64x128xf32> to vector<4x16x128xf32>
    %c0_30 = arith.constant 0 : index
    %c0_31 = arith.constant 0 : index
    %c0_32 = arith.constant 0 : index
    %76 = vector.load %arg6[%c0_30, %c0_31, %c0_32] : memref<4x16x128xf32, #tpu.memory_space<vmem>>, vector<4x16x128xf32>
    tpu.vector_store %arg6[%c0_30, %c0_31, %c0_32], %75 {strides = array<i32>} : memref<4x16x128xf32, #tpu.memory_space<vmem>>, vector<4x16x128xf32>,
    return
  }
  func.func @transform_0(%arg0: i32) -> (i32, i32, i32) {
    %c0_i32 = arith.constant 0 : i32
    %c0_i32_0 = arith.constant 0 : i32
    %c0_i32_1 = arith.constant 0 : i32
    return %arg0, %c0_i32, %c0_i32_0 : i32, i32, i32
  }
  func.func @transform_1(%arg0: i32) -> (i32, i32, i32) {
    %c0_i32 = arith.constant 0 : i32
    %c0_i32_0 = arith.constant 0 : i32
    %c0_i32_1 = arith.constant 0 : i32
    return %arg0, %c0_i32, %c0_i32_0 : i32, i32, i32
  }
  func.func @transform_2(%arg0: i32) -> (i32, i32, i32) {
    %c0_i32 = arith.constant 0 : i32
    %c0_i32_0 = arith.constant 0 : i32
    %c0_i32_1 = arith.constant 0 : i32
    return %arg0, %c0_i32, %c0_i32_0 : i32, i32, i32
  }
  func.func @transform_3(%arg0: i32) -> (i32, i32) {
    %c0_i32 = arith.constant 0 : i32
    %c0_i32_0 = arith.constant 0 : i32
    %c0_i32_1 = arith.constant 0 : i32
    return %c0_i32, %c0_i32_0 : i32, i32
  }
  func.func @transform_4(%arg0: i32) -> (i32, i32) {
    %c0_i32 = arith.constant 0 : i32
    %c0_i32_0 = arith.constant 0 : i32
    %c0_i32_1 = arith.constant 0 : i32
    return %c0_i32, %c0_i32_0 : i32, i32
  }
  func.func @transform_5(%arg0: i32) -> (i32, i32, i32) {
    %c0_i32 = arith.constant 0 : i32
    %c0_i32_0 = arith.constant 0 : i32
    %c0_i32_1 = arith.constant 0 : i32
    return %arg0, %c0_i32, %c0_i32_0 : i32, i32, i32
  }
}

</mosaic_0001>

<bundles_post_ra>
// kernel: tpu_custom_call.1
= control target key start
LH: loop header
LB: loop body
LE: loop exit
PB: predicated region body
PF: predicated region fallthrough
CT: control target
= control target key end

     0   :  { %s3398_s0 = inlined_call_operand.hbm [shape: f32[8,16,128], index: 0, kind: input, shape index: {}]   ;;  %s3399_s1 = inlined_call_operand.hbm [shape: f32[8,16,128], index: 1, kind: input, shape index: {}]   ;;  %s3400_s2 = inlined_call_operand.hbm [shape: f32[8,16,16], index: 2, kind: input, shape index: {}]   ;;  %s3401_s3 = inlined_call_operand.hbm [shape: f32[128,128], index: 3, kind: input, shape index: {}]   ;;  %s3402_s4 = inlined_call_operand.hbm [shape: f32[128,128], index: 4, kind: input, shape index: {}]   ;;  %s3403_s5 = inlined_call_operand.hbm [shape: f32[8,16,128], index: 5, kind: output, shape index: {}]  }
   0x1   :  { %3423 = sst [smem:[#allocation19_spill]] %s3399_s1 }
   0x2   :  { %3424 = sst [smem:[#allocation20_spill]] %s3401_s3 }
   0x3   :  { %10 = vsyncpa [#allocation3], 0 }
   0x4   :  { %12 = vsyncpa [#allocation3 + $0x1], 0 }
   0x5   :  { %13 = vsyncpa [#allocation6], 0 }
   0x6   :  { %15 = vsyncpa [#allocation6 + $0x1], 0 }
   0x7   :  { %16 = vsyncpa [#allocation9], 0 }
   0x8   :  { %17 = vsyncpa [#allocation4], 0 }
   0x9   :  { %19 = vsyncpa [#allocation4 + $0x1], 0  ;;  %s2526_s18 = smov 0   ;;  %s2528_s19 = smov 0  }
   0xa   :  { %s2530_s20 = smov 0   ;;  %s2532_s21 = smov 0  }
   0xb LB: > { %3425 = sst [smem:[#allocation16_spill]] %s2480_s21  ;;  %s2547_s22 = sadd.s32 4294967295, %s2480_s21   ;;  %s2480_s21 = sphi %s2532_s21, %s3474_s21   ;;  %s2476_s20 = sphi %s2530_s20, %s3478_s20   ;;  %s2472_s19 = sphi %s2528_s19, %s3477_s19   ;;  %s2468_s18 = sphi %s2526_s18, %s3476_s18  }
   0xc   : > { %s1745_s23 = sadd.s32 4294967294, %s2480_s21   ;;  %s2551_s24 = sadd.s32 1, %s2480_s21  }
   0xd   : > { %3426 = sst [smem:[#allocation17_spill]] %s2551_s24  ;;  %s32_s25 = sadd.s32 1, %s2476_s20 }
   0xe   : > { %s29_s26 = ssub.s32 %s2480_s21, %s2551_s24  ;;  %p39_p0 = scmp.ne.s32.totalorder %s2476_s20, %s2472_s19 }
   0xf   : > { %p30_p1 = scmp.eq.s32.totalorder %s29_s26, 0  ;;  %p40_p2 = scmp.eq.s32.totalorder %s2480_s21, 0 }
  0x10   : > { %p45_p3 = scmp.ne.s32.totalorder %s2472_s19, %s2468_s18  ;;  %p3404_p4 = scmp.eq.s32.totalorder %s2547_s22, 0 }
  0x11   : > { %s2563_s27 = scalar_select %p30_p1, %s2476_s20, %s32_s25  }
  0x12   : > { %p2565_p5 = por %p40_p2, %p39_p0  ;;  %p2571_p6 = por %p3404_p4, %p45_p3 }
  0x13   : > { %3427 = sst [smem:[#allocation18_spill]] %s2563_s27  ;;  %p163_p7 = scmp.eq.s32.totalorder %s2547_s22, 1 }
  0x14   : > { %s3428_s28 = scalar_select %p2565_p5, 1, 0 }
  0x15   : > { %s3429_s29 = scalar_select %p2571_p6, 1, 0 }
  0x16   : > { %p169_p8 = scmp.eq.s32.totalorder %s1745_s23, 1  ;;  %p1746_p9 = scmp.ge.s32.totalorder %s2480_s21, 1 }
  0x17   : > { %p176_p10 = scmp.lt.s32.totalorder %s2480_s21, 3  ;;  %p2578_p11 = por %p163_p7, %p39_p0 }
  0x18   : > { %p2582_p12 = por %p169_p8, %p45_p3  ;;  %s2482_s8 = smov [#allocation8]  }
  0x19   : > { %s3430_s30 = scalar_select %p2578_p11, 1, 0 }
  0x1a   : > { %s3431_s6 = scalar_select %p2582_p12, 1, 0 }
  0x1b   : > { %p2586_p13 = pnand %p1746_p9, %p176_p10  ;;  %s188_s9 = sshll.u32 %s2482_s8, 4  ;;  %s189_s9 = int_to_ptr.vmem [resolvable:$true] %s188_s9 }
  0x1c   : > { %s3408_s11 = sand.u32 1, %s2476_s20   ;;  %s3434_s3 = sld [smem:[#allocation20_spill]] }
  0x1d   : > { %s3432_s7 = scalar_select %p2586_p13, 1, 0 }
  0x1e   : > { %p2083_p1 = pneg %p2586_p13  ;;  %s2603_s12 = sshll.u32 %s3408_s11, 6 }
  0x20   : > { %p2594_p2 = pnand %p2083_p1, %p3404_p4 }
  0x22   : > { %s3433_s10 = scalar_select %p2594_p2, 1, 0 }
  0x23   : > { %s2260_s15 = scalar_lea.hbm %s3434_s3, 2048  ;;  %p3413_p8 = pneg %p2594_p2 }
  0x24   : > { %p2261_p7 = scmp.ne.s32.totalorder %s3434_s3, %s2260_s15  ;;  %p2267_p1 = scmp.lt.u32.totalorder %s2260_s15, %s3434_s3 }
  0x26   : > { %p2263_p9 = pnand %p3413_p8, %p2261_p7 }
  0x28   : > { %p2264_p10 = pneg %p2263_p9 }
  0x2a   : > { %p2269_p0 = pnand %p2267_p1, %p2264_p10 }
  0x2c   : > { %2272 = shalt.err (!%p2269_p0)
}
  0x2d   : > { %s2273_s26 = scalar_lea.vmem %s189_s9, 2048  ;;  %p2281_p11 = scmp.lt.s32.totalorder %s189_s9, %s189_s9 }
  0x2e   : > { %p2274_p4 = scmp.ne.s32.totalorder %s189_s9, %s2273_s26  ;;  %p2282_p6 = scmp.lt.s32.totalorder %s2273_s26, %s2273_s26 }
  0x30   : > { %p2276_p3 = pnand %p2274_p4, %p3413_p8  ;;  %p2283_p13 = por %p2282_p6, %p2281_p11 }
  0x32   : > { %p2277_p12 = pneg %p2276_p3 }
  0x34   : > { %p2284_p5 = pnand %p2283_p13, %p2277_p12 }
  0x36   : > { %2287 = shalt.err (!%p2284_p5)
}
  0x37   : > { %s3409_s8 = smov 128   ;;  %s3411_s13 = smov 8  }
  0x38   : > { %2086 = dma.hbm_to_vmem [thread:$0]  (!%p2594_p2), %s3434_s3, 2048, %s189_s9, [#allocation9], %s3409_s8, %s3409_s8, %s3411_s13  }
  0x39   : > { %s2631_s16 = sshll.u32 %s2480_s21, 10  ;;  %p3435_p4 = scmp.ne.s32.totalorder %s3428_s28, 0 }
  0x3a   : > { %p3436_p5 = scmp.lt.s32.totalorder %s2480_s21, 2  ;;  %s237_s23 = sand.u32 1, %s2480_s21  }
  0x3b   : > { %s3438_s1 = sld [smem:[#allocation19_spill]]  ;;  %s241_s9 = scalar_lea.vmem [#allocation5], %s2603_s12 }
  0x3c   : > { %p2637_p6 = pnand %p3436_p5, %p3435_p4  ;;  %s249_s14 = sshll.u32 %s241_s9, 4  ;;  %s2649_s14 = int_to_ptr.vmem [resolvable:$true] %s249_s14 }
  0x3d   : > { %s2651_s28 = scalar_lea.sflag [#allocation6], %s237_s23 }
  0x3e   : > { %s3437_s17 = scalar_select %p2637_p6, 1, 0 }
  0x3f   : > { %p2657_p12 = pneg %p2637_p6 }
  0x41   : > { %s2646_s11 = scalar_lea.hbm %s3438_s1, %s2631_s16  ;;  %s2293_s13 = scalar_lea.hbm %s3438_s1, 2048 }
  0x42   : > { %s2288_s15 = scalar_lea.hbm %s2646_s11, 1024  ;;  %p2294_p3 = scmp.lt.u32.totalorder %s2646_s11, %s3438_s1 }
  0x43   : > { %p2289_p11 = scmp.ne.s32.totalorder %s2646_s11, %s2288_s15  ;;  %p2295_p7 = scmp.lt.u32.totalorder %s2293_s13, %s2288_s15 }
  0x44   : > { %s3439_s8 = scalar_select %p2657_p12, 1, 0 }
  0x45   : > { %p2291_p13 = pnand %p2657_p12, %p2289_p11  ;;  %p2296_p9 = por %p2295_p7, %p2294_p3 }
  0x46   : > { %p2297_p10 = scmp.lt.u32.totalorder %s2288_s15, %s2646_s11 }
  0x47   : > { %p2292_p0 = pneg %p2291_p13 }
  0x48   : > { %p2298_p1 = por %p2297_p10, %p2296_p9 }
  0x4a   : > { %p2299_p4 = pnand %p2298_p1, %p2292_p0 }
  0x4c   : > { %2302 = shalt.err (!%p2299_p4)
}
  0x4d   : > { %s2303_s23 = scalar_lea.vmem %s2649_s14, 1024  ;;  %s2485_s25 = smov [#allocation5]  }
  0x4e   : > { %p2304_p5 = scmp.ne.s32.totalorder %s2649_s14, %s2303_s23  ;;  %s2308_s26 = sshll.u32 %s2485_s25, 4  ;;  %s2309_s26 = int_to_ptr.vmem [resolvable:$false] %s2308_s26 }
  0x4f   : > { %s2310_s3 = scalar_lea.vmem %s2309_s26, 2048  ;;  %p2311_p8 = scmp.lt.s32.totalorder %s2649_s14, %s2309_s26 }
  0x50   : > { %p2306_p11 = pnand %p2304_p5, %p2657_p12  ;;  %p2312_p2 = scmp.lt.s32.totalorder %s2310_s3, %s2303_s23 }
  0x52   : > { %p2307_p13 = pneg %p2306_p11  ;;  %p2313_p3 = por %p2312_p2, %p2311_p8 }
  0x54   : > { %p2314_p7 = pnand %p2313_p3, %p2307_p13 }
  0x56   : > { %2317 = shalt.err (!%p2314_p7)
}
  0x57   : > { %s3440_s13 = smov 8   ;;  %s3441_s15 = smov 128  }
  0x58   : > { %2096 = dma.hbm_to_vmem [thread:$0]  (!%p2637_p6), %s2646_s11, 1024, %s2649_s14, %s2651_s28, %s3441_s15, %s3441_s15, %s3440_s13  }
  0x59   : > { %s2486_s9 = smov [#allocation10]   ;;  %s2318_s23 = scalar_lea.hbm %s3402_s4, 2048 }
  0x5a   : > { %s201_s1 = sshll.u32 %s2486_s9, 4  ;;  %p2319_p2 = scmp.ne.s32.totalorder %s3402_s4, %s2318_s23  ;;  %s202_s1 = int_to_ptr.vmem [resolvable:$true] %s201_s1 }
  0x5b   : > { %p3442_p8 = scmp.ne.s32.totalorder %s3433_s10, 0  ;;  %p2325_p1 = scmp.lt.u32.totalorder %s2318_s23, %s3402_s4 }
  0x5d   : > { %p3443_p0 = pneg %p3442_p8 }
  0x5f   : > { %p2321_p9 = pnand %p2319_p2, %p3443_p0 }
  0x61   : > { %p2322_p10 = pneg %p2321_p9 }
  0x63   : > { %p2327_p4 = pnand %p2325_p1, %p2322_p10 }
  0x65   : > { %2330 = shalt.err (!%p2327_p4)
}
  0x66   : > { %s2331_s11 = scalar_lea.vmem %s202_s1, 2048  ;;  %p3444_p11 = pmov %p3443_p0 }
  0x67   : > { %p2332_p5 = scmp.ne.s32.totalorder %s202_s1, %s2331_s11  ;;  %p2339_p7 = scmp.lt.s32.totalorder %s202_s1, %s202_s1 }
  0x68   : > { %p2340_p6 = scmp.lt.s32.totalorder %s2331_s11, %s2331_s11 }
  0x69   : > { %p2334_p13 = pnand %p2332_p5, %p3444_p11 }
  0x6a   : > { %p2341_p12 = por %p2340_p6, %p2339_p7 }
  0x6b   : > { %p2335_p3 = pneg %p2334_p13 }
  0x6d   : > { %p2342_p0 = pnand %p2341_p12, %p2335_p3 }
  0x6f   : > { %2345 = shalt.err (!%p2342_p0)
}
  0x70   : > { %2089 = dma.hbm_to_vmem [thread:$0]  (!%p3442_p8), %s3402_s4, 2048, %s202_s1, [#allocation9], %s3441_s15, %s3441_s15, %s3440_s13  }
  0x71   : > { %s2711_s9 = scalar_lea.hbm %s3398_s0, %s2631_s16  ;;  %s219_s10 = scalar_lea.vmem [#allocation2], %s2603_s12 }
  0x72   : > { %s227_s25 = sshll.u32 %s219_s10, 4  ;;  %s3445_s23 = sand.u32 1, %s2476_s20   ;;  %s2714_s25 = int_to_ptr.vmem [resolvable:$true] %s227_s25 }
  0x73   : > { %s2718_s26 = scalar_lea.sflag [#allocation3], %s3445_s23  ;;  %s2346_s3 = scalar_lea.hbm %s2711_s9, 1024 }
  0x74   : > { %p2347_p6 = scmp.ne.s32.totalorder %s2711_s9, %s2346_s3  ;;  %p3446_p12 = scmp.ne.s32.totalorder %s3439_s8, 0 }
  0x75   : > { %s2351_s21 = scalar_lea.hbm %s3398_s0, 2048  ;;  %p2352_p9 = scmp.lt.u32.totalorder %s2711_s9, %s3398_s0 }
  0x76   : > { %p2349_p2 = pnand %p2347_p6, %p3446_p12  ;;  %p2353_p10 = scmp.lt.u32.totalorder %s2351_s21, %s2346_s3 }
  0x77   : > { %p2355_p4 = scmp.lt.u32.totalorder %s2346_s3, %s2711_s9 }
  0x78   : > { %p2350_p8 = pneg %p2349_p2  ;;  %p2354_p1 = por %p2353_p10, %p2352_p9 }
  0x7a   : > { %p2356_p5 = por %p2355_p4, %p2354_p1 }
  0x7c   : > { %p2357_p11 = pnand %p2356_p5, %p2350_p8 }
  0x7e   : > { %2360 = shalt.err (!%p2357_p11)
}
  0x7f   : > { %s2361_s14 = scalar_lea.vmem %s2714_s25, 1024  ;;  %s2487_s10 = smov [#allocation2]  }
  0x80   : > { %p2362_p13 = scmp.ne.s32.totalorder %s2714_s25, %s2361_s14  ;;  %s2366_s23 = sshll.u32 %s2487_s10, 4  ;;  %s2367_s23 = int_to_ptr.vmem [resolvable:$false] %s2366_s23 }
  0x81   : > { %s2368_s1 = scalar_lea.vmem %s2367_s23, 2048  ;;  %p2369_p0 = scmp.lt.s32.totalorder %s2714_s25, %s2367_s23 }
  0x82   : > { %p2364_p3 = pnand %p2362_p13, %p3446_p12  ;;  %p2370_p6 = scmp.lt.s32.totalorder %s2368_s1, %s2361_s14 }
  0x84   : > { %p2365_p7 = pneg %p2364_p3  ;;  %p2371_p2 = por %p2370_p6, %p2369_p0 }
  0x86   : > { %p2372_p9 = pnand %p2371_p2, %p2365_p7 }
  0x88   : > { %2375 = shalt.err (!%p2372_p9)
}
  0x89   : > { %p3447_p8 = scmp.ne.s32.totalorder %s3437_s17, 0  ;;  %s2749_s21 = scalar_lea.hbm %s3400_s2, %s2631_s16 }
  0x8a   : > { %s263_s24 = scalar_lea.vmem [#allocation7], %s2603_s12  ;;  %s2376_s14 = scalar_lea.hbm %s2749_s21, 1024 }
  0x8b   : > { %2093 = dma.hbm_to_vmem [thread:$0]  (!%p3447_p8), %s2711_s9, 1024, %s2714_s25, %s2718_s26, %s3441_s15, %s3441_s15, %s3440_s13  }
  0x8c   : > { %s271_s27 = sshll.u32 %s263_s24, 4  ;;  %p2377_p10 = scmp.ne.s32.totalorder %s2749_s21, %s2376_s14  ;;  %s2752_s27 = int_to_ptr.vmem [resolvable:$true] %s271_s27 }
  0x8d   : > { %s2381_s25 = scalar_lea.hbm %s3400_s2, 2048  ;;  %p2382_p5 = scmp.lt.u32.totalorder %s2749_s21, %s3400_s2 }
  0x8e   : > { %p2379_p1 = pnand %p2377_p10, %p3446_p12  ;;  %p2383_p11 = scmp.lt.u32.totalorder %s2381_s25, %s2376_s14 }
  0x8f   : > { %p2385_p3 = scmp.lt.u32.totalorder %s2376_s14, %s2749_s21 }
  0x90   : > { %p2380_p4 = pneg %p2379_p1  ;;  %p2384_p13 = por %p2383_p11, %p2382_p5 }
  0x92   : > { %p2386_p7 = por %p2385_p3, %p2384_p13 }
  0x94   : > { %p2387_p0 = pnand %p2386_p7, %p2380_p4 }
  0x96   : > { %2390 = shalt.err (!%p2387_p0)
}
  0x97   : > { %s2391_s12 = scalar_lea.vmem %s2752_s27, 1024  ;;  %s2488_s23 = smov [#allocation7]  }
  0x98   : > { %p2392_p6 = scmp.ne.s32.totalorder %s2752_s27, %s2391_s12  ;;  %s2396_s1 = sshll.u32 %s2488_s23, 4  ;;  %s2397_s1 = int_to_ptr.vmem [resolvable:$false] %s2396_s1 }
  0x99   : > { %s2398_s3 = scalar_lea.vmem %s2397_s1, 2048  ;;  %p2399_p10 = scmp.lt.s32.totalorder %s2752_s27, %s2397_s1 }
  0x9a   : > { %p2394_p2 = pnand %p2392_p6, %p3446_p12  ;;  %p2400_p1 = scmp.lt.s32.totalorder %s2398_s3, %s2391_s12 }
  0x9c   : > { %p2395_p9 = pneg %p2394_p2  ;;  %p2401_p5 = por %p2400_p1, %p2399_p10 }
  0x9e   : > { %p2402_p11 = pnand %p2401_p5, %p2395_p9 }
  0xa0   : > { %2405 = shalt.err (!%p2402_p11)
}
  0xa1   : > { %2099 = dma.hbm_to_vmem [thread:$0]  (!%p3447_p8), %s2749_s21, 1024, %s2752_s27, %s2651_s28, %s3441_s15, %s3441_s15, %s3440_s13  }
  0xa2   : > { %p3448_p12 = scmp.ne.s32.totalorder %s3432_s7, 0 }
  0xa3   : > { %s2782_s8 = sand.u32 (!%p3448_p12), 1, %s2472_s19   ;;  %p3449_p4 = scmp.ne.s32.totalorder (!%p3448_p12), %s3429_s29, 0 }
  0xa4   : > { %283 = sbr.rel (%p3448_p12) target bundleno = 1407 (0x57f), region = 40  ;;  %s2785_s11 = sshll.u32 (!%p3448_p12), %s2782_s8, 6 }
  0xa5   : > { %s286_s17 = scalar_lea.sflag (!%p3448_p12), [#allocation3], %s2782_s8  ;;  %s2789_s24 = scalar_lea.vmem (!%p3448_p12), [#allocation2], %s2785_s11 }
  0xab   : > { %2451 = dma.done.wait (%p3449_p4), %s286_s17, 1024  }
  0xac   : > { %2453 = vsyncadd (%p3449_p4), %s286_s17, 4294966272  ;;  %s294_s7 = sand.u32 1, %s2547_s22   ;;  %s298_s13 = scalar_lea.vmem [#allocation5], %s2785_s11 }
  0xad   : > { %s295_s28 = scalar_lea.sflag [#allocation6], %s294_s7 }
  0xae   : > { %2455 = dma.done.wait (%p3449_p4), %s295_s28, 2048  }
  0xaf   : > { %2457 = vsyncadd (%p3449_p4), %s295_s28, 4294965248  ;;  %s2802_s15 = scalar_lea.vmem [#allocation7], %s2785_s11  ;;  %p3450_p8 = scmp.eq.s32.totalorder %s2547_s22, 0 }
  0xb1   : > { %2459 = dma.done.wait (%p3450_p8), [#allocation9], 4096   ;;  %p3451_p13 = pmov %p3450_p8 }
  0xb2   : > { %vm380_vm0 = vcmask 130048   ;;  %v364_v0 = vld [vmem:[%s298_s13] sm:$0xff]  ;;  %v365_v1 = vld [vmem:[%s298_s13 + $0x8] sm:$0xff]  ;;  %v366_v4 = vld [vmem:[%s298_s13 + $0x10] sm:$0xff]  ;;  %s2489_s29 = smov 1   ;;  %s2490_s21 = smov 127  }
  0xb3   : > { %2461 = vsyncadd (%p3451_p13), [#allocation9], 4294963200  ;;  %v2809_v2 = vld [vmem:[%s2802_s15] sm:$0xff]  ;;  %v1987_v3 = vpack.c.bf16 %v365_v1, %v364_v0  ;;  %v367_v5 = vld [vmem:[%s298_s13 + $0x18] sm:$0xff]  ;;  %s3325_s27 = scalar_lea.vmem [#allocation11], %s2785_s11  ;;  %s1806_s10 = sshll.u32 %s2547_s22, 10 }
  0xb4   : > { %1875 = vmatprep.mubr.msk.f32.mxu0 %vm380_vm0, %v2809_v2  ;;  %v1991_v6 = vpack.c.bf16 %v367_v5, %v366_v4  ;;  %v2814_v7 = vld [vmem:[%s2802_s15 + $0x10] sm:$0xff]  ;;  %v368_v8 = vld [vmem:[%s298_s13 + $0x20] sm:$0xff]  ;;  %v369_v9 = vld [vmem:[%s298_s13 + $0x28] sm:$0xff]  ;;  %v381_v44 = vsel %vm380_vm0, %v2809_v2, 0.0  ;;  %s1610_s14 = sshll.u32 %s3325_s27, 4  ;;  %s3353_s26 = scalar_lea.hbm %s3403_s5, %s1806_s10  ;;  %s3346_s14 = int_to_ptr.vmem [resolvable:$true] %s1610_s14 }
  0xb5   : > { %1988 = vmatprep.subr.bf16.mxu0 %v1987_v3  ;;  %1882 = vmatprep.mubr.msk.f32.mxu1 %vm380_vm0, %v2814_v7  ;;  %v2819_v10 = vld [vmem:[%s2802_s15 + $0x8] sm:$0xff]  ;;  %v1995_v11 = vpack.c.bf16 %v369_v9, %v368_v8  ;;  %v370_v12 = vld [vmem:[%s298_s13 + $0x30] sm:$0xff]  ;;  %v371_v13 = vld [vmem:[%s298_s13 + $0x38] sm:$0xff]  ;;  %v387_v45 = vsel %vm380_vm0, %v2814_v7, 0.0  ;;  %s1596_s22 = scalar_lea.sflag [#allocation4], %s2782_s8  ;;  %s2406_s16 = scalar_lea.vmem %s3346_s14, 1024 }
  0xb6   : > { %1990 = vmatpush3.bf16.msra.mxu0 %v1987_v3  ;;  %1992 = vmatprep.subr.bf16.mxu1 %v1991_v6  ;;  %v2822_v14 = vld [vmem:[%s2802_s15 + $0x18] sm:$0xff]  ;;  %v1999_v15 = vpack.c.bf16 %v371_v13, %v370_v12  ;;  %v882_v16 = vld [vmem:[#allocation10] sm:$0xff]  ;;  %v883_v17 = vld [vmem:[#allocation10 + $0x8] sm:$0xff]  ;;  %v384_v51 = vsel %vm380_vm0, %v2819_v10, 0.0  ;;  %p2407_p3 = scmp.ne.s32.totalorder %s3346_s14, %s2406_s16  ;;  %p3470_p7 = scmp.ne.s32.totalorder %s3430_s30, 0 }
  0xb7   : > { %1994 = vmatpush3.bf16.msra.mxu1 %v1991_v6  ;;  %1996 = vmatprep.subr.bf16.mxu0 %v1995_v11  ;;  %v2825_v18 = vld [vmem:[%s2802_s15 + $0x20] sm:$0xff]  ;;  %v2035_v19 = vpack.c.bf16 %v883_v17, %v882_v16  ;;  %v2830_v20 = vld [vmem:[%s2802_s15 + $0x30] sm:$0xff]  ;;  %v885_v22 = vld [vmem:[#allocation10 + $0x18] sm:$0xff]  ;;  %v390_v52 = vsel %vm380_vm0, %v2822_v14, 0.0  ;;  %s2493_s12 = smov [#allocation11]  }
  0xb8   : > { %2000 = vmatprep.subr.bf16.mxu1 %v1999_v15  ;;  %v884_v21 = vld [vmem:[#allocation10 + $0x10] sm:$0xff]  ;;  %v377_v23 = vld [vmem:[%s2802_s15 + $0x28] sm:$0xff]  ;;  %v2838_v24 = vld [vmem:[%s2802_s15 + $0x38] sm:$0xff]  ;;  %382 = vadd.xlane.f32.xlu0 %v381_v44  ;;  %v393_v57 = vsel %vm380_vm0, %v2825_v18, 0.0  ;;  %v399_v62 = vsel %vm380_vm0, %v2830_v20, 0.0  ;;  %p2408_p0 = pnand %p2407_p3, %p3470_p7  ;;  %s2410_s23 = sshll.u32 %s2493_s12, 4  ;;  %s2411_s23 = int_to_ptr.vmem [resolvable:$false] %s2410_s23 }
  0xb9   : > { %1876 = vmatmul.mubr.msk.f32.vlgmr.msra.gmra.mrb[0].mxu0 %vm380_vm0, %v2819_v10  ;;  %v2039_v25 = vpack.c.bf16 %v885_v22, %v884_v21  ;;  %v886_v26 = vld [vmem:[#allocation10 + $0x20] sm:$0xff]  ;;  %v887_v27 = vld [vmem:[#allocation10 + $0x28] sm:$0xff]  ;;  %v888_v29 = vld [vmem:[#allocation10 + $0x30] sm:$0xff]  ;;  %388 = vadd.xlane.f32.xlu1 %v387_v45  ;;  %v396_v58 = vsel %vm380_vm0, %v377_v23, 0.0  ;;  %v402_v63 = vsel %vm380_vm0, %v2838_v24, 0.0  ;;  %s2412_s1 = scalar_lea.vmem %s2411_s23, 2048  ;;  %p2413_p2 = scmp.lt.s32.totalorder %s3346_s14, %s2411_s23 }
  0xba   : > { %1883 = vmatmul.mubr.msk.f32.vlgmr.msra.gmra.mrb[0].mxu1 %vm380_vm0, %v2822_v14  ;;  %1998 = vmatpush3.bf16.msra.mxu0 %v1995_v11  ;;  %v2043_v28 = vpack.c.bf16 %v887_v27, %v886_v26  ;;  %v889_v30 = vld [vmem:[#allocation10 + $0x38] sm:$0xff]  ;;  %v890_v32 = vld [vmem:[#allocation10 + $0x40] sm:$0xff]  ;;  %v891_v33 = vld [vmem:[#allocation10 + $0x48] sm:$0xff]  ;;  %p2409_p6 = pneg %p2408_p0  ;;  %p2414_p9 = scmp.lt.s32.totalorder %s2412_s1, %s2406_s16 }
  0xbb   : > { %1889 = vmatprep.mubr.msk.f32.mxu0 %vm380_vm0, %v2825_v18  ;;  %2002 = vmatpush3.bf16.msra.mxu1 %v1999_v15  ;;  %v2047_v31 = vpack.c.bf16 %v889_v30, %v888_v29  ;;  %v2051_v34 = vpack.c.bf16 %v891_v33, %v890_v32  ;;  %v892_v35 = vld [vmem:[#allocation10 + $0x50] sm:$0xff]  ;;  %v893_v36 = vld [vmem:[#allocation10 + $0x58] sm:$0xff]  ;;  %v894_v38 = vld [vmem:[#allocation10 + $0x60] sm:$0xff] }
  0xbc   : > { %1896 = vmatprep.mubr.msk.f32.mxu1 %vm380_vm0, %v2830_v20  ;;  %2036 = vmatprep.subr.bf16.mxu1 %v2035_v19  ;;  %v2055_v37 = vpack.c.bf16 %v893_v36, %v892_v35  ;;  %v895_v39 = vld [vmem:[#allocation10 + $0x68] sm:$0xff]  ;;  %v896_v41 = vld [vmem:[#allocation10 + $0x70] sm:$0xff]  ;;  %v897_v42 = vld [vmem:[#allocation10 + $0x78] sm:$0xff]  ;;  %p2415_p10 = por %p2414_p9, %p2413_p2 }
  0xbd   : > { %1890 = vmatmul.mubr.msk.f32.vlgmr.msra.gmra.mrb[2].mxu0 %vm380_vm0, %v377_v23  ;;  %v2059_v40 = vpack.c.bf16 %v895_v39, %v894_v38  ;;  %v2063_v43 = vpack.c.bf16 %v897_v42, %v896_v41  ;;  %v761_v46 = vld [vmem:[#allocation8] sm:$0xff]  ;;  %v762_v47 = vld [vmem:[#allocation8 + $0x8] sm:$0xff]  ;;  %v763_v49 = vld [vmem:[#allocation8 + $0x10] sm:$0xff]  ;;  %385 = vadd.xlane.f32.xlu0 %v384_v51 }
  0xbe   : > { %1897 = vmatmul.mubr.msk.f32.vlgmr.msra.gmra.mrb[2].mxu1 %vm380_vm0, %v2838_v24  ;;  %v2003_v48 = vpack.c.bf16 %v762_v47, %v761_v46  ;;  %v764_v50 = vld [vmem:[#allocation8 + $0x18] sm:$0xff]  ;;  %v765_v54 = vld [vmem:[#allocation8 + $0x20] sm:$0xff]  ;;  %v766_v55 = vld [vmem:[#allocation8 + $0x28] sm:$0xff]  ;;  %391 = vadd.xlane.f32.xlu1 %v390_v52  ;;  %p2416_p1 = pnand %p2415_p10, %p2409_p6 }
  0xbf   : > { %2038 = vmatpush3.bf16.msra.mxu1 %v2035_v19  ;;  %v2007_v53 = vpack.c.bf16 %v764_v50, %v763_v49  ;;  %v356_v56 = vld [vmem:[%s2789_s24] sm:$0xff]  ;;  %v2011_v59 = vpack.c.bf16 %v766_v55, %v765_v54  ;;  %v767_v60 = vld [vmem:[#allocation8 + $0x30] sm:$0xff]  ;;  %v768_v61 = vld [vmem:[#allocation8 + $0x38] sm:$0xff] }
  0xc0   : > { %2040 = vmatprep.subr.bf16.mxu1 %v2039_v25  ;;  %2004 = vmatprep.subr.bf16.mxu0 %v2003_v48  ;;  %v2015_v0 = vpack.c.bf16 %v768_v61, %v767_v60  ;;  %v769_v1 = vld [vmem:[#allocation8 + $0x40] sm:$0xff]  ;;  %v770_v2 = vld [vmem:[#allocation8 + $0x48] sm:$0xff]  ;;  %v771_v4 = vld [vmem:[#allocation8 + $0x50] sm:$0xff] }
  0xc1   : > { %2006 = vmatpush3.bf16.msra.mxu0 %v2003_v48  ;;  %1931 = vmatprep.mubr.f32.mxu0 %v356_v56  ;;  %v2019_v3 = vpack.c.bf16 %v770_v2, %v769_v1  ;;  %v772_v5 = vld [vmem:[#allocation8 + $0x58] sm:$0xff]  ;;  %v773_v7 = vld [vmem:[#allocation8 + $0x60] sm:$0xff]  ;;  %v774_v8 = vld [vmem:[#allocation8 + $0x68] sm:$0xff] }
  0xc2   : > { %2008 = vmatprep.subr.bf16.mxu0 %v2007_v53  ;;  %394 = vadd.xlane.f32.xlu0 %v393_v57  ;;  %v2023_v6 = vpack.c.bf16 %v772_v5, %v771_v4  ;;  %v2027_v9 = vpack.c.bf16 %v774_v8, %v773_v7  ;;  %v775_v10 = vld [vmem:[#allocation8 + $0x70] sm:$0xff]  ;;  %v776_v11 = vld [vmem:[#allocation8 + $0x78] sm:$0xff]  ;;  %v357_v13 = vld [vmem:[%s2789_s24 + $0x8] sm:$0xff] }
  0xc3   : > { %2042 = vmatpush3.bf16.msra.mxu1 %v2039_v25  ;;  %397 = vadd.xlane.f32.xlu1 %v396_v58  ;;  %v2031_v12 = vpack.c.bf16 %v776_v11, %v775_v10  ;;  %v358_v14 = vld [vmem:[%s2789_s24 + $0x10] sm:$0xff]  ;;  %v359_v15 = vld [vmem:[%s2789_s24 + $0x18] sm:$0xff]  ;;  %v360_v16 = vld [vmem:[%s2789_s24 + $0x20] sm:$0xff] }
  0xc4   : > { %2044 = vmatprep.subr.bf16.mxu1 %v2043_v28  ;;  %v361_v17 = vld [vmem:[%s2789_s24 + $0x28] sm:$0xff]  ;;  %v362_v18 = vld [vmem:[%s2789_s24 + $0x30] sm:$0xff]  ;;  %v363_v19 = vld [vmem:[%s2789_s24 + $0x38] sm:$0xff] }
  0xc5   : > { %2010 = vmatpush3.bf16.msra.mxu0 %v2007_v53 }
  0xc6   : > { %2012 = vmatprep.subr.bf16.mxu0 %v2011_v59  ;;  %400 = vadd.xlane.f32.xlu0 %v399_v62 }
  0xc7   : > { %2046 = vmatpush3.bf16.msra.mxu1 %v2043_v28  ;;  %403 = vadd.xlane.f32.xlu1 %v402_v63 }
  0xc8   : > { %2048 = vmatprep.subr.bf16.mxu1 %v2047_v31 }
  0xc9   : > { %2014 = vmatpush3.bf16.msra.mxu0 %v2011_v59 }
  0xca   : > { %2016 = vmatprep.subr.bf16.mxu0 %v2015_v0 }
  0xcb   : > { %2050 = vmatpush3.bf16.msra.mxu1 %v2047_v31 }
  0xcc   : > { %2052 = vmatprep.subr.bf16.mxu1 %v2051_v34 }
  0xcd   : > { %2018 = vmatpush3.bf16.msra.mxu0 %v2015_v0 }
  0xce   : > { %2020 = vmatprep.subr.bf16.mxu0 %v2019_v3 }
  0xcf   : > { %2054 = vmatpush3.bf16.msra.mxu1 %v2051_v34 }
  0xd0   : > { %2056 = vmatprep.subr.bf16.mxu1 %v2055_v37 }
  0xd1   : > { %2022 = vmatpush3.bf16.msra.mxu0 %v2019_v3 }
  0xd2   : > { %2024 = vmatprep.subr.bf16.mxu0 %v2023_v6 }
  0xd3   : > { %2058 = vmatpush3.bf16.msra.mxu1 %v2055_v37 }
  0xd4   : > { %2060 = vmatprep.subr.bf16.mxu1 %v2059_v40 }
  0xd5   : > { %2026 = vmatpush3.bf16.msra.mxu0 %v2023_v6 }
  0xd6   : > { %2028 = vmatprep.subr.bf16.mxu0 %v2027_v9 }
  0xd7   : > { %2062 = vmatpush3.bf16.msra.mxu1 %v2059_v40 }
  0xd8   : > { %2064 = vmatprep.subr.bf16.mxu1 %v2063_v43 }
  0xd9   : > { %2030 = vmatpush3.bf16.msra.mxu0 %v2027_v9 }
  0xda   : > { %2032 = vmatprep.subr.bf16.mxu0 %v2031_v12 }
  0xdb   : > { %2066 = vmatpush3.bf16.msra.mxu1 %v2063_v43 }
  0xdd   : > { %2034 = vmatpush3.bf16.msra.mxu0 %v2031_v12 }
  0xe0   : > { %1932 = vmatmul.mubr.f32.vlgmr.msra.gmra.mrb[4].mxu0 %v357_v13 }
  0xe1   : > { %1934 = vmatprep.mubr.f32.mxu0 %v358_v14 }
  0xe4   : > { %1935 = vmatmul.mubr.f32.gmra.mrb[6].mxu0 %v359_v15 }
  0xe5   : > { %1937 = vmatprep.mubr.f32.mxu0 %v360_v16 }
  0xe8   : > { %1938 = vmatmul.mubr.f32.gmra.mrb[8].mxu0 %v361_v17 }
  0xe9   : > { %1940 = vmatprep.mubr.f32.mxu0 %v362_v18 }
  0xec   : > { %1941 = vmatmul.mubr.f32.gmra.mrb[10].mxu0 %v363_v19 }
 0x145   : > { %v383_v35 = vpop.xlane.xlu0 %382 }
 0x146   : > { %v389_v36 = vpop.xlane.xlu1 %388  ;;  %vm405_vm2 = vcmp.eq.f32.partialorder %v383_v35, 0.0 }
 0x147   : > { %v413_v41 = vsel %vm405_vm2, 1.0, %v383_v35  ;;  %vm407_vm5 = vcmp.eq.f32.partialorder %v389_v36, 0.0 }
 0x148   : > { %v415_v47 = vsel %vm407_vm5, 1.0, %v389_v36 }
 0x14a   : > { %v386_v37 = vpop.xlane.xlu0 %385 }
 0x14b   : > { %vm406_vm1 = vcmp.eq.f32.partialorder %v386_v37, 0.0  ;;  %v392_v38 = vpop.xlane.xlu1 %391 }
 0x14c   : > { %v414_v39 = vsel %vm406_vm1, 1.0, %v386_v37  ;;  %vm408_vm3 = vcmp.eq.f32.partialorder %v392_v38, 0.0 }
 0x14d   : > { %2156 = vrcp.f32 %v414_v39  ;;  %v416_v42 = vsel %vm408_vm3, 1.0, %v392_v38 }
 0x14e   : > { %2158 = vrcp.f32 %v413_v41 }
 0x14f   : > { %v395_v40 = vpop.xlane.xlu0 %394  ;;  %2160 = vrcp.f32 %v416_v42 }
 0x150   : > { %v398_v43 = vpop.xlane.xlu1 %397  ;;  %vm409_vm4 = vcmp.eq.f32.partialorder %v395_v40, 0.0 }
 0x151   : > { %v417_v46 = vsel %vm409_vm4, 1.0, %v395_v40  ;;  %vm410_vm6 = vcmp.eq.f32.partialorder %v398_v43, 0.0 }
 0x152   : > { %2162 = vrcp.f32 %v417_v46  ;;  %v418_v49 = vsel %vm410_vm6, 1.0, %v398_v43 }
 0x153   : > { %v401_v45 = vpop.xlane.xlu0 %400  ;;  %2164 = vrcp.f32 %v415_v47 }
 0x154   : > { %vm411_vm7 = vcmp.eq.f32.partialorder %v401_v45, 0.0  ;;  %v404_v48 = vpop.xlane.xlu1 %403  ;;  %2166 = vrcp.f32 %v418_v49 }
 0x155   : > { %v419_v51 = vsel %vm411_vm7, 1.0, %v401_v45  ;;  %vm412_vm8 = vcmp.eq.f32.partialorder %v404_v48, 0.0 }
 0x156   : > { %2168 = vrcp.f32 %v419_v51  ;;  %v420_v55 = vsel %vm412_vm8, 1.0, %v404_v48 }
 0x157   : > { %v2908_v50 = vpop.eup %2156  ;;  %2170 = vrcp.f32 %v420_v55 }
 0x158   : > { %v2910_v53 = vpop.eup %2158 }
 0x159   : > { %v2913_v57 = vpop.eup %2160 }
 0x15c   : > { %v2919_v62 = vpop.eup %2162 }
 0x15d   : > { %v2922_v63 = vpop.eup %2164 }
 0x15e   : > { %v2925_v3 = vpop.eup %2166 }
 0x160   : > { %v2928_v5 = vpop.eup %2168 }
 0x161   : > { %v2933_v9 = vpop.eup %2170 }
 0x18c   : > { %v2868_v20 = vpop.f32.mrb[0].mxu0 }
 0x18d   : > { %v2870_v21 = vpop.f32.mrb[1].mxu0  ;;  %v2872_v22 = vpop.f32.mrb[0].mxu1 }
 0x18e   : > { %1975 = vmatprep.mubr.f32.mxu1 %v2870_v21  ;;  %v2875_v23 = vpop.f32.mrb[1].mxu1 }
 0x18f   : > { %1976 = vmatmul.mubr.f32.vlgmr.msra.gmra.mrb[4].mxu1 %v2868_v20 }
 0x190   : > { %1978 = vmatprep.mubr.f32.mxu1 %v2875_v23  ;;  %v2879_v24 = vpop.f32.mrb[2].mxu0 }
 0x191   : > { %v2881_v25 = vpop.f32.mrb[3].mxu0  ;;  %v2883_v26 = vpop.f32.mrb[2].mxu1 }
 0x192   : > { %v2885_v27 = vpop.f32.mrb[3].mxu1 }
 0x193   : > { %1979 = vmatmul.mubr.f32.gmra.mrb[6].mxu1 %v2872_v22 }
 0x194   : > { %1981 = vmatprep.mubr.f32.mxu1 %v2881_v25 }
 0x197   : > { %1982 = vmatmul.mubr.f32.gmra.mrb[8].mxu1 %v2879_v24 }
 0x198   : > { %1984 = vmatprep.mubr.f32.mxu1 %v2885_v27 }
 0x19b   : > { %1985 = vmatmul.mubr.f32.gmra.mrb[10].mxu1 %v2883_v26 }
 0x1b3   : > { %v2892_v28 = vpop.f32.mrb[4].mxu0 }
 0x1b4   : > { %v2894_v29 = vpop.f32.mrb[5].mxu0 }
 0x1b7   : > { %v2896_v30 = vpop.f32.mrb[6].mxu0 }
 0x1b8   : > { %v2898_v31 = vpop.f32.mrb[7].mxu0 }
 0x1bb   : > { %v2900_v32 = vpop.f32.mrb[8].mxu0 }
 0x1bc   : > { %v2902_v33 = vpop.f32.mrb[9].mxu0 }
 0x1bf   : > { %v2904_v34 = vpop.f32.mrb[10].mxu0 }
 0x1c0   : > { %v2906_v44 = vpop.f32.mrb[11].mxu0 }
 0x262   : > { %v1977_v52 = vpop.f32.mrb[4].mxu1 }
 0x263   : > { %v1108_v54 = vmul.f32 %v2908_v50, %v1977_v52  ;;  %v964_v56 = vpop.f32.mrb[5].mxu1 }
 0x264   : > { %v1107_v58 = vmul.f32 %v2910_v53, %v964_v56 }
 0x265   : > { %1125 = vrot.lane.b32.xlu1 %v1108_v54, %s2489_s29 }
 0x266   : > { %1123 = vrot.lane.b32.xlu0 %v1107_v58, %s2489_s29  ;;  %v1980_v59 = vpop.f32.mrb[6].mxu1 }
 0x267   : > { %v1110_v60 = vmul.f32 %v2913_v57, %v1980_v59  ;;  %v974_v61 = vpop.f32.mrb[7].mxu1 }
 0x268   : > { %v1109_v1 = vmul.f32 %v2922_v63, %v974_v61 }
 0x269   : > { %1129 = vrot.lane.b32.xlu1 %v1110_v60, %s2489_s29 }
 0x26a   : > { %v1983_v0 = vpop.f32.mrb[8].mxu1 }
 0x26b   : > { %v984_v2 = vpop.f32.mrb[9].mxu1  ;;  %v1112_v7 = vmul.f32 %v2925_v3, %v1983_v0 }
 0x26c   : > { %v1111_v4 = vmul.f32 %v2919_v62, %v984_v2 }
 0x26d   : > { %1127 = vrot.lane.b32.xlu1 %v1109_v1, %s2489_s29 }
 0x26e   : > { %1131 = vrot.lane.b32.xlu0 %v1111_v4, %s2489_s29  ;;  %v1986_v6 = vpop.f32.mrb[10].mxu1 }
 0x26f   : > { %v994_v8 = vpop.f32.mrb[11].mxu1  ;;  %v1114_v11 = vmul.f32 %v2933_v9, %v1986_v6 }
 0x270   : > { %v1113_v10 = vmul.f32 %v2928_v5, %v994_v8 }
 0x271   : > { %1133 = vrot.lane.b32.xlu1 %v1112_v7, %s2489_s29 }
 0x272   : > { %1135 = vrot.lane.b32.xlu0 %v1113_v10, %s2489_s29 }
 0x275   : > { %1137 = vrot.lane.b32.xlu1 %v1114_v11, %s2489_s29 }
 0x2d7   : > { %v1126_v12 = vpop.permute.xlu1 %1125 }
 0x2d8   : > { %v1148_v13 = vadd.f32 %v2892_v28, %v1126_v12  ;;  %v1124_v14 = vpop.permute.xlu0 %1123 }
 0x2d9   : > { %v2942_v15 = vadd.f32 %v1124_v14, %v2894_v29 }
 0x2da   : > { %v1156_v16 = vmul.f32 0.16666667, %v1148_v13  ;;  %v1213_v17 = vmul.f32 1.442695, %v1148_v13  ;;  %v1196_v58 = vand.u32 2147483647, %v1148_v13 }
 0x2db   : > { %v1130_v18 = vpop.permute.xlu1 %1129  ;;  %v1155_v19 = vmul.f32 0.16666667, %v2942_v15  ;;  %v1211_v37 = vmul.f32 1.442695, %v2942_v15  ;;  %vm1244_vm9 = vcmp.gt.f32.partialorder %v1148_v13, 0.0  ;;  %vm1243_vm10 = vcmp.gt.f32.partialorder %v2942_v15, 0.0 }
 0x2dc   : > { %v2946_v35 = vadd.f32 %v2896_v30, %v1130_v18  ;;  %v1164_v36 = vadd.f32 0.5, %v1156_v16  ;;  %2172 = vpow2.f32 %v1213_v17  ;;  %v1195_v60 = vand.u32 2147483647, %v2942_v15 }
 0x2dd   : > { %v1163_v39 = vadd.f32 0.5, %v1155_v19  ;;  %2174 = vpow2.f32 %v1211_v37  ;;  %vm1204_vm11 = vcmp.lt.f32.partialorder %v1196_v58, 0.01 }
 0x2de   : > { %v1172_v38 = vmul.f32 %v1164_v36, %v1148_v13  ;;  %v1158_v40 = vmul.f32 0.16666667, %v2946_v35  ;;  %v1217_v41 = vmul.f32 1.442695, %v2946_v35  ;;  %v1198_v61 = vand.u32 2147483647, %v2946_v35 }
 0x2df   : > { %v1128_v42 = vpop.permute.xlu1 %1127  ;;  %v1171_v48 = vmul.f32 %v1163_v39, %v2942_v15  ;;  %vm2974_vm12 = vcmp.lt.f32.partialorder %v1195_v60, 0.01  ;;  %vm1246_vm14 = vcmp.gt.f32.partialorder %v2946_v35, 0.0 }
 0x2e0   : > { %v2952_v43 = vadd.f32 %v1128_v42, %v2898_v31  ;;  %v1132_v45 = vpop.permute.xlu0 %1131  ;;  %v1166_v46 = vadd.f32 0.5, %v1158_v40  ;;  %2176 = vpow2.f32 %v1217_v41  ;;  %v1180_v47 = vadd.f32 1.0, %v1172_v38 }
 0x2e1   : > { %v2957_v51 = vadd.f32 %v1132_v45, %v2902_v33  ;;  %v1179_v2 = vadd.f32 1.0, %v1171_v48  ;;  %vm2978_vm13 = vcmp.lt.f32.partialorder %v1198_v61, 0.01 }
 0x2e2   : > { %v1157_v49 = vmul.f32 0.16666667, %v2952_v43  ;;  %v1174_v54 = vmul.f32 %v1166_v46, %v2946_v35  ;;  %v1215_v55 = vmul.f32 1.442695, %v2952_v43  ;;  %v1188_v1 = vmul.f32 %v1180_v47, %v1148_v13 }
 0x2e3   : > { %v1134_v52 = vpop.permute.xlu1 %1133  ;;  %v1159_v12 = vmul.f32 0.16666667, %v2957_v51  ;;  %v1187_v40 = vmul.f32 %v1179_v2, %v2942_v15  ;;  %v1219_v47 = vmul.f32 1.442695, %v2957_v51  ;;  %v1197_v58 = vand.u32 2147483647, %v2952_v43 }
 0x2e4   : > { %v2962_v56 = vadd.f32 %v2900_v32, %v1134_v52  ;;  %v1165_v59 = vadd.f32 0.5, %v1157_v49  ;;  %2178 = vpow2.f32 %v1215_v55  ;;  %v1136_v6 = vpop.permute.xlu0 %1135  ;;  %v1182_v10 = vadd.f32 1.0, %v1174_v54 }
 0x2e5   : > { %v2983_v38 = vadd.f32 %v1136_v6, %v2906_v44  ;;  %v1167_v46 = vadd.f32 0.5, %v1159_v12  ;;  %vm1205_vm15 = vcmp.lt.f32.partialorder %v1197_v58, 0.01  ;;  %vm1245_vm0 = vcmp.gt.f32.partialorder %v2952_v43, 0.0 }
 0x2e6   : > { %v2173_v0 = vpop.eup %2172  ;;  %v1160_v4 = vmul.f32 0.16666667, %v2962_v56  ;;  %v1221_v11 = vmul.f32 1.442695, %v2962_v56  ;;  %v1173_v16 = vmul.f32 %v1165_v59, %v2952_v43  ;;  %v1190_v45 = vmul.f32 %v1182_v10, %v2946_v35 }
 0x2e7   : > { %v1138_v7 = vpop.permute.xlu1 %1137  ;;  %v1786_v8 = vadd.f32 -1.0, %v2173_v0  ;;  %v2175_v18 = vpop.eup %2174  ;;  %v1161_v2 = vmul.f32 0.16666667, %v2983_v38  ;;  %v1200_v10 = vand.u32 2147483647, %v2962_v56  ;;  %vm1248_vm2 = vcmp.gt.f32.partialorder %v2962_v56, 0.0 }
 0x2e8   : > { %v2971_v14 = vadd.f32 %v2904_v34, %v1138_v7  ;;  %v1168_v17 = vadd.f32 0.5, %v1160_v4  ;;  %2180 = vpow2.f32 %v1221_v11  ;;  %v1785_v41 = vadd.f32 -1.0, %v2175_v18 }
 0x2e9   : > { %v1236_v19 = vsel %vm1204_vm11, %v1188_v1, %v1786_v8  ;;  %v1181_v52 = vadd.f32 1.0, %v1173_v16  ;;  %2182 = vpow2.f32 %v1219_v47  ;;  %v1223_v8 = vmul.f32 1.442695, %v2983_v38 }
 0x2ea   : > { %v2986_v39 = vsel %vm1244_vm9, %v1148_v13, %v1236_v19  ;;  %v2177_v42 = vpop.eup %2176  ;;  %v1162_v48 = vmul.f32 0.16666667, %v2971_v14  ;;  %v1235_v49 = vsel %vm2974_vm12, %v1187_v40, %v1785_v41  ;;  %v1176_v54 = vmul.f32 %v1168_v17, %v2962_v56 }
 0x2eb   : > { %1269 = vrot.lane.b32.xlu1 %v2986_v39, %s2490_s21  ;;  %v1788_v13 = vadd.f32 -1.0, %v2177_v42  ;;  %v3000_v55 = vsel %vm1243_vm10, %v2942_v15, %v1235_v49  ;;  %v1225_v59 = vmul.f32 1.442695, %v2971_v14  ;;  %v1175_v15 = vmul.f32 %v1167_v46, %v2957_v51 }
 0x2ec   : > { %1267 = vrot.lane.b32.xlu0 %v3000_v55, %s2490_s21  ;;  %v1170_v61 = vadd.f32 0.5, %v1162_v48  ;;  %v1189_v4 = vmul.f32 %v1181_v52, %v2952_v43  ;;  %v1184_v7 = vadd.f32 1.0, %v1176_v54  ;;  %v1169_v11 = vadd.f32 0.5, %v1161_v2 }
 0x2ed   : > { %v1238_v60 = vsel %vm2978_vm13, %v1190_v45, %v1788_v13  ;;  %2184 = vpow2.f32 %v1225_v59  ;;  %v1183_v36 = vadd.f32 1.0, %v1175_v15  ;;  %vm1208_vm1 = vcmp.lt.f32.partialorder %v1200_v10, 0.01 }
 0x2ee   : > { %v2179_v0 = vpop.eup %2178  ;;  %v3010_v1 = vsel %vm1246_vm14, %v2946_v35, %v1238_v60  ;;  %v1178_v12 = vmul.f32 %v1170_v61, %v2971_v14  ;;  %2186 = vpow2.f32 %v1223_v8  ;;  %v1192_v18 = vmul.f32 %v1184_v7, %v2962_v56 }
 0x2ef   : > { %1273 = vrot.lane.b32.xlu1 %v3010_v1, %s2490_s21  ;;  %v1787_v6 = vadd.f32 -1.0, %v2179_v0  ;;  %v1199_v37 = vand.u32 2147483647, %v2957_v51  ;;  %v1177_v40 = vmul.f32 %v1169_v11, %v2983_v38  ;;  %v1202_v46 = vand.u32 2147483647, %v2971_v14 }
 0x2f0   : > { %v1186_v42 = vadd.f32 1.0, %v1178_v12  ;;  %v1191_v47 = vmul.f32 %v1183_v36, %v2957_v51  ;;  %vm1247_vm4 = vcmp.gt.f32.partialorder %v2957_v51, 0.0  ;;  %vm1250_vm6 = vcmp.gt.f32.partialorder %v2971_v14, 0.0 }
 0x2f1   : > { %v1237_v35 = vsel %vm1205_vm15, %v1189_v4, %v1787_v6  ;;  %vm1207_vm3 = vcmp.lt.f32.partialorder %v1199_v37, 0.01  ;;  %v1185_v13 = vadd.f32 1.0, %v1177_v40  ;;  %vm1210_vm5 = vcmp.lt.f32.partialorder %v1202_v46, 0.01 }
 0x2f2   : > { %v2181_v16 = vpop.eup %2180  ;;  %v3022_v17 = vsel %vm1245_vm0, %v2952_v43, %v1237_v35  ;;  %v1194_v54 = vmul.f32 %v1186_v42, %v2971_v14  ;;  %vm1249_vm8 = vcmp.gt.f32.partialorder %v2983_v38, 0.0  ;;  %v1061_v6 = vmul.f32 1.442695, %v2892_v28 }
 0x2f3   : > { %1271 = vrot.lane.b32.xlu0 %v3022_v17, %s2490_s21  ;;  %v1790_v19 = vadd.f32 -1.0, %v2181_v16  ;;  %v2183_v45 = vpop.eup %2182  ;;  %v1193_v15 = vmul.f32 %v1185_v13, %v2983_v38  ;;  %v1003_v7 = vmul.f32 0.16666667, %v2894_v29  ;;  %v1059_v8 = vmul.f32 1.442695, %v2894_v29 }
 0x2f4   : > { %v1789_v48 = vadd.f32 -1.0, %v2183_v45  ;;  %2188 = vpow2.f32 %v1061_v6  ;;  %v1065_v11 = vmul.f32 1.442695, %v2896_v30  ;;  %v1006_v35 = vmul.f32 0.16666667, %v2896_v30 }
 0x2f5   : > { %v1240_v41 = vsel %vm1208_vm1, %v1192_v18, %v1790_v19  ;;  %v1011_v12 = vadd.f32 0.5, %v1003_v7  ;;  %2190 = vpow2.f32 %v1059_v8  ;;  %v1005_v16 = vmul.f32 0.16666667, %v2898_v31 }
 0x2f6   : > { %v3031_v43 = vsel %vm1248_vm2, %v2962_v56, %v1240_v41  ;;  %v1239_v52 = vsel %vm1207_vm3, %v1191_v47, %v1789_v48  ;;  %v1201_v56 = vand.u32 2147483647, %v2983_v38  ;;  %v1063_v18 = vmul.f32 1.442695, %v2898_v31 }
 0x2f7   : > { %1277 = vrot.lane.b32.xlu1 %v3031_v43, %s2490_s21  ;;  %v2185_v49 = vpop.eup %2184  ;;  %v3041_v59 = vsel %vm1247_vm4, %v2957_v51, %v1239_v52  ;;  %2192 = vpow2.f32 %v1065_v11  ;;  %v1014_v19 = vadd.f32 0.5, %v1006_v35  ;;  %v1019_v36 = vmul.f32 %v1011_v12, %v2894_v29 }
 0x2f8   : > { %v1792_v58 = vadd.f32 -1.0, %v2185_v49  ;;  %v2187_v60 = vpop.eup %2186  ;;  %1275 = vrot.lane.b32.xlu0 %v3041_v59, %s2490_s21  ;;  %vm1209_vm7 = vcmp.lt.f32.partialorder %v1201_v56, 0.01  ;;  %v1013_v40 = vadd.f32 0.5, %v1005_v16  ;;  %2194 = vpow2.f32 %v1063_v18 }
 0x2f9   : > { %v1791_v2 = vadd.f32 -1.0, %v2187_v60  ;;  %v1044_v42 = vand.u32 2147483647, %v2892_v28  ;;  %v1008_v45 = vmul.f32 0.16666667, %v2900_v32  ;;  %v1022_v47 = vmul.f32 %v2896_v30, %v1014_v19 }
 0x2fa   : > { %v1242_v61 = vsel %vm1210_vm5, %v1194_v54, %v1792_v58  ;;  %v1069_v46 = vmul.f32 1.442695, %v2900_v32  ;;  %v1027_v48 = vadd.f32 1.0, %v1019_v36  ;;  %v1043_v49 = vand.u32 2147483647, %v2894_v29 }
 0x2fb   : > { %v3047_v0 = vsel %vm1250_vm6, %v2971_v14, %v1242_v61  ;;  %v1241_v51 = vsel %vm1209_vm7, %v1193_v15, %v1791_v2  ;;  %v1004_v14 = vmul.f32 0.16666667, %v2892_v28  ;;  %v1021_v54 = vmul.f32 %v1013_v40, %v2898_v31 }
 0x2fc   : > { %1281 = vrot.lane.b32.xlu1 %v3047_v0, %s2490_s21  ;;  %v3054_v4 = vsel %vm1249_vm8, %v2983_v38, %v1241_v51  ;;  %vm3075_vm9 = vcmp.lt.f32.partialorder %v1044_v42, 0.01  ;;  %v1016_v60 = vadd.f32 0.5, %v1008_v45  ;;  %2196 = vpow2.f32 %v1069_v46 }
 0x2fd   : > { %1279 = vrot.lane.b32.xlu0 %v3054_v4, %s2490_s21  ;;  %v1012_v10 = vadd.f32 0.5, %v1004_v14  ;;  %v1067_v61 = vmul.f32 1.442695, %v2902_v33  ;;  %v1030_v15 = vadd.f32 1.0, %v1022_v47  ;;  %v1007_v2 = vmul.f32 0.16666667, %v2902_v33 }
 0x2fe   : > { %v2189_v41 = vpop.eup %2188  ;;  %v1035_v6 = vmul.f32 %v1027_v48, %v2894_v29  ;;  %vm3082_vm10 = vcmp.lt.f32.partialorder %v1043_v49, 0.01  ;;  %v1046_v7 = vand.u32 2147483647, %v2896_v30  ;;  %v1073_v8 = vmul.f32 1.442695, %v2904_v34 }
 0x2ff   : > { %v1020_v38 = vmul.f32 %v2892_v28, %v1012_v10  ;;  %v1778_v52 = vadd.f32 -1.0, %v2189_v41  ;;  %v2191_v58 = vpop.eup %2190  ;;  %v1029_v35 = vadd.f32 1.0, %v1021_v54  ;;  %v1010_v12 = vmul.f32 0.16666667, %v2904_v34 }
 0x300   : > { %v1777_v11 = vadd.f32 -1.0, %v2191_v58  ;;  %vm1092_vm11 = vcmp.gt.f32.partialorder %v2892_v28, 0.0  ;;  %v1024_v16 = vmul.f32 %v2900_v32, %v1016_v60  ;;  %2198 = vpow2.f32 %v1067_v61 }
 0x301   : > { %v1028_v37 = vadd.f32 1.0, %v1020_v38  ;;  %v2193_v51 = vpop.eup %2192  ;;  %v1045_v38 = vand.u32 2147483647, %v2898_v31  ;;  %v1038_v19 = vmul.f32 %v2896_v30, %v1030_v15  ;;  %v1071_v40 = vmul.f32 1.442695, %v2906_v44 }
 0x302   : > { %v2195_v18 = vpop.eup %2194  ;;  %v1780_v36 = vadd.f32 -1.0, %v2193_v51  ;;  %vm1091_vm12 = vcmp.gt.f32.partialorder %v2894_v29, 0.0  ;;  %vm3097_vm13 = vcmp.lt.f32.partialorder %v1046_v7, 0.01  ;;  %2200 = vpow2.f32 %v1073_v8 }
 0x303   : > { %v1036_v13 = vmul.f32 %v2892_v28, %v1028_v37  ;;  %v1015_v37 = vadd.f32 0.5, %v1007_v2  ;;  %v1009_v42 = vmul.f32 0.16666667, %v2906_v44  ;;  %v1083_v47 = vsel %vm3082_vm10, %v1035_v6, %v1777_v11 }
 0x304   : > { %v1037_v48 = vmul.f32 %v1029_v35, %v2898_v31  ;;  %v1018_v49 = vadd.f32 0.5, %v1010_v12  ;;  %vm3111_vm14 = vcmp.lt.f32.partialorder %v1045_v38, 0.01  ;;  %v1779_v54 = vadd.f32 -1.0, %v2195_v18 }
 0x305   : > { %v1084_v10 = vsel %vm3075_vm9, %v1036_v13, %v1778_v52  ;;  %v1032_v58 = vadd.f32 1.0, %v1024_v16  ;;  %v1086_v56 = vsel %vm3097_vm13, %v1038_v19, %v1780_v36  ;;  %vm1094_vm15 = vcmp.gt.f32.partialorder %v2896_v30, 0.0 }
 0x306   : > { %v3103_v46 = vsel %vm1092_vm11, %v2892_v28, %v1084_v10  ;;  %v1023_v28 = vmul.f32 %v1015_v37, %v2902_v33  ;;  %2202 = vpow2.f32 %v1071_v40  ;;  %v2197_v60 = vpop.eup %2196  ;;  %v3124_v2 = vsel %vm1091_vm12, %v2894_v29, %v1083_v47 }
 0x307   : > { %v1048_v51 = vand.u32 2147483647, %v2900_v32  ;;  %v1017_v6 = vadd.f32 0.5, %v1009_v42  ;;  %v1026_v7 = vmul.f32 %v2904_v34, %v1018_v49  ;;  %v3134_v10 = vsel %vm1094_vm15, %v2896_v30, %v1086_v56 }
 0x308   : > { %v1085_v11 = vsel %vm3111_vm14, %v1037_v48, %v1779_v54  ;;  %vm1093_vm0 = vcmp.gt.f32.partialorder %v2898_v31, 0.0  ;;  %v1040_v29 = vmul.f32 %v2900_v32, %v1032_v58  ;;  %v1782_v38 = vadd.f32 -1.0, %v2197_v60 }
 0x309   : > { %v1031_v16 = vadd.f32 1.0, %v1023_v28  ;;  %vm3147_vm1 = vcmp.lt.f32.partialorder %v1048_v51, 0.01  ;;  %v1047_v19 = vand.u32 2147483647, %v2902_v33  ;;  %v1025_v36 = vmul.f32 %v1017_v6, %v2906_v44 }
 0x30a   : > { %v2199_v30 = vpop.eup %2198  ;;  %v1034_v40 = vadd.f32 1.0, %v1026_v7  ;;  %vm1096_vm2 = vcmp.gt.f32.partialorder %v2900_v32, 0.0  ;;  %v1050_v47 = vand.u32 2147483647, %v2904_v34  ;;  %v1088_v49 = vsel %vm3147_vm1, %v1040_v29, %v1782_v38 }
 0x30b   : > { %v1039_v52 = vmul.f32 %v1031_v16, %v2902_v33  ;;  %v1781_v54 = vadd.f32 -1.0, %v2199_v30  ;;  %vm3170_vm3 = vcmp.lt.f32.partialorder %v1047_v19, 0.01  ;;  %v1033_v56 = vadd.f32 1.0, %v1025_v36 }
 0x30c   : > { %v2201_v41 = vpop.eup %2200  ;;  %v1042_v60 = vmul.f32 %v2904_v34, %v1034_v40  ;;  %v1049_v51 = vand.u32 2147483647, %v2906_v44  ;;  %v3181_v7 = vsel %vm1096_vm2, %v2900_v32, %v1088_v49  ;;  %vm3183_vm4 = vcmp.lt.f32.partialorder %v1050_v47, 0.01 }
 0x30d   : > { %v1087_v29 = vsel %vm3170_vm3, %v1039_v52, %v1781_v54  ;;  %vm1095_vm5 = vcmp.gt.f32.partialorder %v2902_v33, 0.0  ;;  %v1041_v38 = vmul.f32 %v1033_v56, %v2906_v44  ;;  %vm1098_vm6 = vcmp.gt.f32.partialorder %v2904_v34, 0.0 }
 0x30e   : > { %vm1057_vm7 = vcmp.lt.f32.partialorder %v1049_v51, 0.01  ;;  %v3202_v19 = vsel %vm1095_vm5, %v2902_v33, %v1087_v29  ;;  %vm1097_vm8 = vcmp.gt.f32.partialorder %v2906_v44, 0.0 }
 0x35d   : > { %v1270_v45 = vpop.permute.xlu1 %1269 }
 0x35e   : > { %v3109_v13 = vmax.f32 %v3103_v46, %v1270_v45  ;;  %v1268_v15 = vpop.permute.xlu0 %1267  ;;  %v3160_v45 = vsel %vm1093_vm0, %v2898_v31, %v1085_v11  ;;  %v2203_v31 = vpop.eup %2202 }
 0x35f   : > { %v3130_v14 = vmax.f32 %v3124_v2, %v1268_v15  ;;  %v1784_v15 = vadd.f32 -1.0, %v2201_v41  ;;  %v1783_v16 = vadd.f32 -1.0, %v2203_v31 }
 0x360   : > { %v1300_v61 = vsub.f32 %v3103_v46, %v3109_v13  ;;  %1333 = vrot.lane.b32.xlu1 %v3109_v13, %s2489_s29 }
 0x361   : > { %v1274_v8 = vpop.permute.xlu1 %1273  ;;  %v1299_v35 = vsub.f32 %v3124_v2, %v3130_v14  ;;  %1331 = vrot.lane.b32.xlu0 %v3130_v14, %s2489_s29  ;;  %v1090_v32 = vsel %vm3183_vm4, %v1042_v60, %v1784_v15 }
 0x362   : > { %v3143_v12 = vmax.f32 %v3134_v10, %v1274_v8  ;;  %v3208_v41 = vsel %vm1098_vm6, %v2904_v34, %v1090_v32 }
 0x364   : > { %v1302_v37 = vsub.f32 %v3134_v10, %v3143_v12  ;;  %1337 = vrot.lane.b32.xlu1 %v3143_v12, %s2489_s29 }
 0x365   : > { %v1272_v42 = vpop.permute.xlu0 %1271 }
 0x366   : > { %v3165_v48 = vmax.f32 %v3160_v45, %v1272_v42  ;;  %v1089_v42 = vsel %vm1057_vm7, %v1041_v38, %v1783_v16 }
 0x367   : > { %v3221_v54 = vsel %vm1097_vm8, %v2906_v44, %v1089_v42 }
 0x368   : > { %v1301_v28 = vsub.f32 %v3160_v45, %v3165_v48  ;;  %1335 = vrot.lane.b32.xlu0 %v3165_v48, %s2489_s29 }
 0x369   : > { %v1278_v6 = vpop.permute.xlu1 %1277 }
 0x36a   : > { %v3188_v11 = vmax.f32 %v3181_v7, %v1278_v6  ;;  %v1276_v18 = vpop.permute.xlu0 %1275 }
 0x36b   : > { %v3205_v36 = vmax.f32 %v3202_v19, %v1276_v18 }
 0x36c   : > { %v1304_v30 = vsub.f32 %v3181_v7, %v3188_v11  ;;  %1341 = vrot.lane.b32.xlu1 %v3188_v11, %s2489_s29 }
 0x36d   : > { %v1303_v47 = vsub.f32 %v3202_v19, %v3205_v36  ;;  %1339 = vrot.lane.b32.xlu0 %v3205_v36, %s2489_s29 }
 0x36e   : > { %v1282_v40 = vpop.permute.xlu1 %1281  ;;  %v1317_v46 = vmul.f32 1.442695, %v1304_v30 }
 0x36f   : > { %v3216_v49 = vmax.f32 %v3208_v41, %v1282_v40  ;;  %v1280_v52 = vpop.permute.xlu0 %1279  ;;  %v1315_v10 = vmul.f32 1.442695, %v1303_v47 }
 0x370   : > { %v3226_v34 = vmax.f32 %v3221_v54, %v1280_v52 }
 0x371   : > { %v1306_v33 = vsub.f32 %v3208_v41, %v3216_v49  ;;  %1345 = vrot.lane.b32.xlu1 %v3216_v49, %s2489_s29 }
 0x372   : > { %v1305_v58 = vsub.f32 %v3221_v54, %v3226_v34  ;;  %1343 = vrot.lane.b32.xlu0 %v3226_v34, %s2489_s29 }
 0x373   : > { %v1321_v45 = vmul.f32 1.442695, %v1306_v33 }
 0x374   : > { %v1319_v7 = vmul.f32 1.442695, %v1305_v58 }
 0x3d2   : > { %v1334_v56 = vpop.permute.xlu1 %1333 }
 0x3d3   : > { %v1356_v31 = vsub.f32 %v2986_v39, %v1334_v56  ;;  %v1332_v15 = vpop.permute.xlu0 %1331 }
 0x3d4   : > { %v1355_v44 = vsub.f32 %v3000_v55, %v1332_v15 }
 0x3d5   : > { %v1365_v60 = vmul.f32 1.442695, %v1356_v31 }
 0x3d6   : > { %v1338_v51 = vpop.permute.xlu1 %1337  ;;  %v1363_v6 = vmul.f32 1.442695, %v1355_v44 }
 0x3d7   : > { %2204 = vpow2.f32 %v1365_v60  ;;  %v1358_v8 = vsub.f32 %v3010_v1, %v1338_v51 }
 0x3d8   : > { %2206 = vpow2.f32 %v1363_v6 }
 0x3d9   : > { %v1369_v29 = vmul.f32 1.442695, %v1358_v8 }
 0x3da   : > { %v1336_v38 = vpop.permute.xlu0 %1335 }
 0x3db   : > { %2208 = vpow2.f32 %v1369_v29  ;;  %v1357_v16 = vsub.f32 %v3022_v17, %v1336_v38  ;;  %v2491_v29 = vmov 0   ;;  %v1309_v38 = vmul.f32 1.442695, %v1300_v61 }
 0x3dc   : > { %2153 = vset.pattern.permute.xlu1 %v2491_v29  ;;  %2152 = vset.pattern.permute.xlu0 %v2491_v29 }
 0x3dd   : > { %v1367_v32 = vmul.f32 1.442695, %v1357_v16  ;;  %v1307_v16 = vmul.f32 1.442695, %v1299_v35 }
 0x3de   : > { %v1342_v18 = vpop.permute.xlu1 %1341 }
 0x3df   : > { %2210 = vpow2.f32 %v1367_v32  ;;  %v1360_v39 = vsub.f32 %v3031_v43, %v1342_v18  ;;  %v1340_v55 = vpop.permute.xlu0 %1339  ;;  %v1313_v32 = vmul.f32 1.442695, %v1302_v37  ;;  %v1311_v18 = vmul.f32 1.442695, %v1301_v28 }
 0x3e0   : > { %v1359_v1 = vsub.f32 %v3041_v59, %v1340_v55 }
 0x3e1   : > { %v3237_v40 = vpop.eup %2204  ;;  %v1373_v42 = vmul.f32 1.442695, %v1360_v39 }
 0x3e2   : > { %1389 = vrot.lane.b32.xlu1 %v3237_v40, %s2490_s21  ;;  %v3241_v52 = vpop.eup %2206  ;;  %v1371_v31 = vmul.f32 1.442695, %v1359_v1 }
 0x3e3   : > { %2212 = vpow2.f32 %v1373_v42  ;;  %v1346_v56 = vpop.permute.xlu1 %1345  ;;  %1387 = vrot.lane.b32.xlu0 %v3241_v52, %s2490_s21 }
 0x3e4   : > { %v1362_v43 = vsub.f32 %v3047_v0, %v1346_v56  ;;  %2214 = vpow2.f32 %v1371_v31  ;;  %v1344_v15 = vpop.permute.xlu0 %1343 }
 0x3e5   : > { %v3246_v17 = vpop.eup %2208  ;;  %v1361_v44 = vsub.f32 %v3054_v4, %v1344_v15 }
 0x3e6   : > { %1393 = vrot.lane.b32.xlu1 %v3246_v17, %s2490_s21  ;;  %v1377_v60 = vmul.f32 1.442695, %v1362_v43 }
 0x3e7   : > { %v1375_v59 = vmul.f32 1.442695, %v1361_v44 }
 0x3e8   : > { %2216 = vpow2.f32 %v1377_v60 }
 0x3e9   : > { %v3252_v51 = vpop.eup %2210  ;;  %2218 = vpow2.f32 %v1375_v59 }
 0x3ea   : > { %1391 = vrot.lane.b32.xlu0 %v3252_v51, %s2490_s21  ;;  %2220 = vpow2.f32 %v1309_v38 }
 0x3eb   : > { %2222 = vpow2.f32 %v1307_v16 }
 0x3ec   : > { %2224 = vpow2.f32 %v1313_v32 }
 0x3ed   : > { %v3256_v6 = vpop.eup %2212  ;;  %2226 = vpow2.f32 %v1311_v18 }
 0x3ee   : > { %1397 = vrot.lane.b32.xlu1 %v3256_v6, %s2490_s21  ;;  %v3260_v0 = vpop.eup %2214  ;;  %2228 = vpow2.f32 %v1317_v46 }
 0x3ef   : > { %1395 = vrot.lane.b32.xlu0 %v3260_v0, %s2490_s21 }
 0x3f2   : > { %v3264_v8 = vpop.eup %2216 }
 0x3f3   : > { %1401 = vrot.lane.b32.xlu1 %v3264_v8, %s2490_s21  ;;  %v3268_v4 = vpop.eup %2218 }
 0x3f4   : > { %1399 = vrot.lane.b32.xlu0 %v3268_v4, %s2490_s21  ;;  %v2221_v13 = vpop.eup %2220 }
 0x3f5   : > { %v2223_v14 = vpop.eup %2222 }
 0x3f6   : > { %v2225_v37 = vpop.eup %2224 }
 0x3f7   : > { %v2227_v11 = vpop.eup %2226 }
 0x3f8   : > { %v2229_v36 = vpop.eup %2228 }
 0x454   : > { %v1390_v61 = vpop.permute.xlu1 %1389 }
 0x455   : > { %v1412_v2 = vadd.f32 %v2221_v13, %v1390_v61  ;;  %v1388_v35 = vpop.permute.xlu0 %1387 }
 0x456   : > { %v1411_v12 = vadd.f32 %v2223_v14, %v1388_v35  ;;  %v2492_v35 = vmov 1  }
 0x457   : > { %2230 = vrcp.f32 %v1412_v2 }
 0x458   : > { %v1394_v48 = vpop.permute.xlu1 %1393  ;;  %2232 = vrcp.f32 %v1411_v12 }
 0x459   : > { %v1414_v28 = vadd.f32 %v2225_v37, %v1394_v48  ;;  %2234 = vpow2.f32 %v1315_v10 }
 0x45b   : > { %2236 = vrcp.f32 %v1414_v28 }
 0x45c   : > { %2238 = vpow2.f32 %v1321_v45  ;;  %v1392_v30 = vpop.permute.xlu0 %1391 }
 0x45d   : > { %v1413_v19 = vadd.f32 %v2227_v11, %v1392_v30  ;;  %2240 = vpow2.f32 %v1319_v7 }
 0x45f   : > { %2242 = vrcp.f32 %v1413_v19 }
 0x460   : > { %v1398_v39 = vpop.permute.xlu1 %1397 }
 0x461   : > { %v2231_v47 = vpop.eup %2230  ;;  %v1416_v41 = vadd.f32 %v2229_v36, %v1398_v39  ;;  %v1396_v42 = vpop.permute.xlu0 %1395 }
 0x462   : > { %1445 = vrot.lane.b32.xlu1 %v2231_v47, %s2489_s29  ;;  %v2233_v49 = vpop.eup %2232  ;;  %v1428_v38 = vmul.f32 %v2231_v47, %v2221_v13 }
 0x463   : > { %2244 = vrcp.f32 %v1416_v41  ;;  %v2235_v33 = vpop.eup %2234  ;;  %1443 = vrot.lane.b32.xlu0 %v2233_v49, %s2489_s29  ;;  %v1427_v16 = vmul.f32 %v2233_v49, %v2223_v14 }
 0x464   : > { %v1415_v34 = vadd.f32 %v2235_v33, %v1396_v42 }
 0x465   : > { %v2237_v54 = vpop.eup %2236  ;;  %v1402_v55 = vpop.permute.xlu1 %1401 }
 0x466   : > { %v2239_v58 = vpop.eup %2238  ;;  %1449 = vrot.lane.b32.xlu1 %v2237_v54, %s2489_s29  ;;  %2246 = vrcp.f32 %v1415_v34  ;;  %v1400_v43 = vpop.permute.xlu0 %1399  ;;  %v1430_v18 = vmul.f32 %v2237_v54, %v2225_v37  ;;  %v2252_v34 = vld [vmem:[%s2789_s24 + $0x8] sm:$0xff] }
 0x467   : > { %v1418_v1 = vadd.f32 %v2239_v58, %v1402_v55  ;;  %v2241_v56 = vpop.eup %2240 }
 0x468   : > { %v1417_v60 = vadd.f32 %v2241_v56, %v1400_v43 }
 0x469   : > { %v2243_v31 = vpop.eup %2242  ;;  %2248 = vrcp.f32 %v1418_v1  ;;  %v2253_v1 = vld [vmem:[%s2789_s24] sm:$0xff] }
 0x46a   : > { %1447 = vrot.lane.b32.xlu0 %v2243_v31, %s2489_s29  ;;  %2250 = vrcp.f32 %v1417_v60  ;;  %v1429_v32 = vmul.f32 %v2243_v31, %v2227_v11 }
 0x46d   : > { %v2245_v15 = vpop.eup %2244 }
 0x46e   : > { %1453 = vrot.lane.b32.xlu1 %v2245_v15, %s2489_s29  ;;  %v1432_v61 = vmul.f32 %v2245_v15, %v2229_v36  ;;  %v2254_v15 = vld [vmem:[%s2789_s24 + $0x18] sm:$0xff] }
 0x470   : > { %v2247_v44 = vpop.eup %2246 }
 0x471   : > { %1451 = vrot.lane.b32.xlu0 %v2247_v44, %s2489_s29  ;;  %v1431_v46 = vmul.f32 %v2247_v44, %v2235_v33 }
 0x473   : > { %v2249_v59 = vpop.eup %2248 }
 0x474   : > { %1457 = vrot.lane.b32.xlu1 %v2249_v59, %s2489_s29  ;;  %v2251_v29 = vpop.eup %2250  ;;  %v1434_v10 = vmul.f32 %v2249_v59, %v2239_v58 }
 0x475   : > { %1455 = vrot.lane.b32.xlu0 %v2251_v29, %s2489_s29  ;;  %v1433_v2 = vmul.f32 %v2251_v29, %v2241_v56 }
 0x478   : > { %1490 = vperm.xlu1 %2153, %v1428_v38   ;;  %v2255_v38 = vld [vmem:[%s2789_s24 + $0x10] sm:$0xff] }
 0x479   : > { %1485 = vperm.xlu0 %2152, %v1427_v16  }
 0x47c   : > { %1495 = vperm.xlu1 %2153, %v1429_v32  }
 0x47d   : > { %1500 = vperm.xlu0 %2152, %v1430_v18  }
 0x480   : > { %1505 = vperm.xlu1 %2153, %v1431_v46   ;;  %v2256_v46 = vld [vmem:[%s2789_s24 + $0x28] sm:$0xff] }
 0x481   : > { %1510 = vperm.xlu0 %2152, %v1432_v61  }
 0x484   : > { %1515 = vperm.xlu1 %2153, %v1433_v2  }
 0x485   : > { %1520 = vperm.xlu0 %2152, %v1434_v10   ;;  %v2257_v10 = vld [vmem:[%s2789_s24 + $0x20] sm:$0xff] }
 0x488   : > { %2155 = vset.pattern.permute.xlu1 %v2492_v35 }
 0x489   : > { %2154 = vset.pattern.permute.xlu0 %v2492_v35 }
 0x4d4   : > { %v1446_v13 = vpop.permute.xlu1 %1445 }
 0x4d5   : > { %v1468_v12 = vmul.f32 %v3237_v40, %v1446_v13  ;;  %v1444_v45 = vpop.permute.xlu0 %1443 }
 0x4d6   : > { %v1467_v37 = vmul.f32 %v3241_v52, %v1444_v45 }
 0x4d7   : > { %v1476_v14 = vmul.f32 %v2908_v50, %v1468_v12 }
 0x4d8   : > { %v1450_v48 = vpop.permute.xlu1 %1449  ;;  %v1475_v28 = vmul.f32 %v2910_v53, %v1467_v37 }
 0x4d9   : > { %1538 = vperm.xlu0 %2154, %v1476_v14   ;;  %v1470_v7 = vmul.f32 %v3246_v17, %v1450_v48 }
 0x4da   : > { %1533 = vperm.xlu1 %2155, %v1475_v28  }
 0x4db   : > { %v1478_v11 = vmul.f32 %v2913_v57, %v1470_v7  ;;  %v2259_v7 = vld [vmem:[%s2789_s24 + $0x30] sm:$0xff] }
 0x4dc   : > { %v1448_v30 = vpop.permute.xlu0 %1447 }
 0x4dd   : > { %v1469_v19 = vmul.f32 %v3252_v51, %v1448_v30 }
 0x4de   : > { %1548 = vperm.xlu1 %2155, %v1478_v11  }
 0x4df   : > { %v1477_v36 = vmul.f32 %v2922_v63, %v1469_v19 }
 0x4e0   : > { %v1454_v40 = vpop.permute.xlu1 %1453 }
 0x4e1   : > { %v1472_v50 = vmul.f32 %v3256_v6, %v1454_v40 }
 0x4e2   : > { %1543 = vperm.xlu1 %2155, %v1477_v36  }
 0x4e3   : > { %v1480_v52 = vmul.f32 %v2925_v3, %v1472_v50  ;;  %v1452_v47 = vpop.permute.xlu0 %1451 }
 0x4e4   : > { %v1471_v53 = vmul.f32 %v3260_v0, %v1452_v47 }
 0x4e6   : > { %v1458_v39 = vpop.permute.xlu1 %1457  ;;  %v1479_v17 = vmul.f32 %v2919_v62, %v1471_v53  ;;  %1558 = vperm.xlu1 %2155, %v1480_v52  }
 0x4e7   : > { %v1474_v57 = vmul.f32 %v3264_v8, %v1458_v39  ;;  %v1456_v63 = vpop.permute.xlu0 %1455 }
 0x4e8   : > { %1553 = vperm.xlu0 %2154, %v1479_v17   ;;  %v1473_v41 = vmul.f32 %v3268_v4, %v1456_v63 }
 0x4e9   : > { %v1482_v51 = vmul.f32 %v2933_v9, %v1474_v57 }
 0x4ea   : > { %v1481_v3 = vmul.f32 %v2928_v5, %v1473_v41 }
 0x4eb   : > { %1568 = vperm.xlu1 %2155, %v1482_v51  }
 0x4ec   : > { %1563 = vperm.xlu0 %2154, %v1481_v3  }
 0x4f7   : > { %v1491_v0 = vpop.permute.xlu1 %1490 }
 0x4f8   : > { %v1486_v6 = vpop.permute.xlu0 %1485  ;;  %v1524_v58 = vmul.f32 %v2252_v34, %v1491_v0 }
 0x4f9   : > { %v1523_v56 = vmul.f32 %v2253_v1, %v1486_v6 }
 0x4fb   : > { %v1496_v62 = vpop.permute.xlu1 %1495 }
 0x4fc   : > { %v1501_v49 = vpop.permute.xlu0 %1500 }
 0x4fd   : > { %v1526_v44 = vmul.f32 %v2254_v15, %v1501_v49 }
 0x4ff   : > { %v1506_v8 = vpop.permute.xlu1 %1505 }
 0x500   : > { %v1511_v33 = vpop.permute.xlu0 %1510  ;;  %v1527_v35 = vmul.f32 %v2257_v10, %v1506_v8 }
 0x501   : > { %v1528_v61 = vmul.f32 %v2256_v46, %v1511_v33 }
 0x503   : > { %v1516_v9 = vpop.permute.xlu1 %1515 }
 0x504   : > { %v1521_v42 = vpop.permute.xlu0 %1520  ;;  %v1529_v11 = vmul.f32 %v2259_v7, %v1516_v9 }
 0x558   : > { %v1539_v54 = vpop.permute.xlu0 %1538 }
 0x559   : > { %v1572_v4 = vmul.f32 %v2868_v20, %v1539_v54  ;;  %v1534_v5 = vpop.permute.xlu1 %1533 }
 0x55a   : > { %v1571_v31 = vmul.f32 %v1534_v5, %v2870_v21  ;;  %v1525_v21 = vmul.f32 %v2255_v38, %v1496_v62 }
 0x55b   : > { %v1580_v55 = vadd.f32 %v1572_v4, %v1524_v58 }
 0x55c   : > { %v1579_v43 = vadd.f32 %v1571_v31, %v1523_v56 }
 0x55d   : > { %1588 = vst [vmem:[%s3325_s27 + $0x8] sm:$0xff] %v1580_v55  ;;  %v1549_v60 = vpop.permute.xlu1 %1548 }
 0x55e   : > { %1587 = vst [vmem:[%s3325_s27] sm:$0xff] %v1579_v43  ;;  %v1574_v20 = vmul.f32 %v2872_v22, %v1549_v60 }
 0x560   : > { %v1582_v59 = vadd.f32 %v1574_v20, %v1526_v44 }
 0x561   : > { %v1544_v29 = vpop.permute.xlu1 %1543 }
 0x562   : > { %1590 = vst [vmem:[%s3325_s27 + $0x18] sm:$0xff] %v1582_v59  ;;  %v1573_v16 = vmul.f32 %v1544_v29, %v2875_v23  ;;  %v2258_v23 = vld [vmem:[%s2789_s24 + $0x38] sm:$0xff] }
 0x563   : > { %v1530_v45 = vmul.f32 %v2258_v23, %v1521_v42 }
 0x564   : > { %v1581_v32 = vadd.f32 %v1573_v16, %v1525_v21 }
 0x565   : > { %v1559_v18 = vpop.permute.xlu1 %1558 }
 0x566   : > { %1589 = vst [vmem:[%s3325_s27 + $0x10] sm:$0xff] %v1581_v32  ;;  %v1576_v2 = vmul.f32 %v2879_v24, %v1559_v18 }
 0x567   : > { %v1554_v22 = vpop.permute.xlu0 %1553 }
 0x568   : > { %v1575_v13 = vmul.f32 %v1554_v22, %v2881_v25  ;;  %v1584_v12 = vadd.f32 %v1576_v2, %v1528_v61 }
 0x56a   : > { %v1569_v14 = vpop.permute.xlu1 %1568  ;;  %v1583_v37 = vadd.f32 %v1575_v13, %v1527_v35  ;;  %1592 = vst [vmem:[%s3325_s27 + $0x28] sm:$0xff] %v1584_v12 }
 0x56b   : > { %v1578_v48 = vmul.f32 %v2883_v26, %v1569_v14  ;;  %v1564_v24 = vpop.permute.xlu0 %1563 }
 0x56c   : > { %1591 = vst [vmem:[%s3325_s27 + $0x20] sm:$0xff] %v1583_v37  ;;  %v1577_v25 = vmul.f32 %v1564_v24, %v2885_v27 }
 0x56d   : > { %v1586_v28 = vadd.f32 %v1578_v48, %v1530_v45 }
 0x56e   : > { %v1585_v26 = vadd.f32 %v1577_v25, %v1529_v11 }
 0x56f   : > { %1594 = vst [vmem:[%s3325_s27 + $0x38] sm:$0xff] %v1586_v28 }
 0x570   : > { %1593 = vst [vmem:[%s3325_s27 + $0x30] sm:$0xff] %v1585_v26 }
 0x571   : > { %2419 = shalt.err (!%p2416_p1)
}
 0x572   : > { %s2420_s3 = scalar_lea.hbm %s3353_s26, 1024  ;;  %s2424_s24 = scalar_lea.hbm %s3403_s5, 2048 }
 0x573   : > { %p2421_p5 = scmp.ne.s32.totalorder %s3353_s26, %s2420_s3  ;;  %p2425_p4 = scmp.lt.u32.totalorder %s3353_s26, %s3403_s5 }
 0x574   : > { %p2426_p8 = scmp.lt.u32.totalorder %s2424_s24, %s2420_s3  ;;  %p2428_p3 = scmp.lt.u32.totalorder %s2420_s3, %s3353_s26 }
 0x575   : > { %p2422_p11 = pnand %p2421_p5, %p3470_p7 }
 0x576   : > { %p2427_p13 = por %p2426_p8, %p2425_p4 }
 0x577   : > { %p2423_p12 = pneg %p2422_p11 }
 0x578   : > { %p2429_p0 = por %p2428_p3, %p2427_p13 }
 0x57a   : > { %p2430_p6 = pnand %p2429_p0, %p2423_p12 }
 0x57c   : > { %2433 = shalt.err (!%p2430_p6)
}
 0x57d   : > { %s2494_s13 = smov 128   ;;  %s2495_s15 = smov 8  }
 0x57e   : > { %2081 = dma.vmem_to_hbm [thread:$0]  (%p3470_p7), %s3346_s14, 1024, %s3353_s26, %s1596_s22, %s2494_s13, %s2494_s13, %s2495_s15  }
 0x57f PF: > { %s3471_s29 = sld [smem:[#allocation16_spill]]  ;;  %s1625_s21 = sand.u32 1, %s2468_s18  }
 0x580   : > { %p3472_p2 = scmp.ne.s32.totalorder %s3431_s6, 0  ;;  %s1626_s27 = scalar_lea.sflag [#allocation4], %s1625_s21 }
 0x585   : > { %p3473_p9 = scmp.ge.s32.totalorder %s3471_s29, 2 }
 0x587   : > { %p2101_p10 = pnand %p3473_p9, %p3472_p2 }
 0x589   : > { %2463 = dma.done.wait (!%p2101_p10), %s1626_s27, 1024  }
 0x58a   : > { %2465 = vsyncadd (!%p2101_p10), %s1626_s27, 4294966272  ;;  %s3474_s21 = sld [smem:[#allocation17_spill]]  ;;  %s3475_s10 = sld [smem:[#allocation18_spill]] }
 0x58b   : > { %s3476_s18 = smov %s2472_s19  ;;  %s3477_s19 = smov %s2476_s20 }
 0x590   : > { %p22_p1 = scmp.ge.s32.totalorder %s3474_s21, 4   ;;  %s3478_s20 = smov %s3475_s10 }
 0x592   :  { %24 = sbr.rel (!%p22_p1) target bundleno = 11 (0xb), region = 117 }
 0x599   :  { %1631 = vsyncpa [#allocation3], 1 }
 0x59a   :  { %1633 = vsyncpa [#allocation3 + $0x1], 1 }
 0x59b   :  { %1634 = vsyncpa [#allocation6], 1 }
 0x59c   :  { %1636 = vsyncpa [#allocation6 + $0x1], 1 }
 0x59d   :  { %1637 = vsyncpa [#allocation9], 1 }
 0x59e   :  { %1638 = vsyncpa [#allocation4], 1 }
 0x59f   :  { %1640 = vsyncpa [#allocation4 + $0x1], 1 }

</bundles_post_ra>
